<compile_context>
chip_gen: v6e
topology: v6e:2x2x1
jax: 0.10.0
libtpu: 0.0.40
codegen_flags: <defaults>
</compile_context>

<pallas_src>
import jax
import jax.numpy as jnp
from jax import lax
from jax.experimental import pallas as pl
from jax.experimental.pallas import tpu as pltpu


def _cos_attn_kernel(q_ref, k_ref, out_ref):
    # q_ref:   (TQ, C) f32 -- query rows (x^T tile for this grid step)
    # k_ref:   (C,  N) f32 -- full key matrix (x flattened over space)
    # out_ref: (TQ, N) f32 -- attention rows (softmax over the key axis)
    q = q_ref[...]
    k = k_ref[...]

    # Gram-matrix tile on the MXU (contraction over channels).
    energy = jnp.dot(q, k, preferred_element_type=jnp.float32)      # (TQ, N)

    # Inverse L2 norms. Multiply the (TQ, N) slab by broadcast reciprocals
    # instead of dividing it element-wise (keeps EUP work to (TQ,1)+(1,N)).
    inv_qn = lax.rsqrt(jnp.sum(q * q, axis=1, keepdims=True))        # (TQ, 1)
    inv_kn = lax.rsqrt(jnp.sum(k * k, axis=0, keepdims=True))        # (1,  N)
    cos = energy * inv_qn * inv_kn                                   # (TQ, N)

    # Row softmax over keys (the full key axis is resident, so no online pass).
    m = jnp.max(cos, axis=-1, keepdims=True)                         # (TQ, 1)
    e = jnp.exp(cos - m)                                             # (TQ, N)
    denom = jnp.sum(e, axis=-1, keepdims=True)                       # (TQ, 1)
    out_ref[...] = e * (1.0 / denom)


def _pick_query_tile(n, *, max_block_bytes=2 * 1024 * 1024):
    """Largest divisor of n (multiple of 8, or n itself) whose (tq, n) f32
    output block stays under ~max_block_bytes. Big tiles amortize the per-step
    pipeline overhead and keep stores lane-dense."""
    max_rows = max(8, max_block_bytes // (4 * n))
    if n <= max_rows:
        return n
    best = None
    for d in range(1, n + 1):
        if n % d == 0 and d % 8 == 0 and d <= max_rows:
            best = d
    return best if best is not None else n


def cos_attn(x, *, tq=None):
    """x: (C, W, H) float feature map (as the PyTorch module expects).

    Returns attention of shape (1, N, N), N = W*H, matching the module output.
    """
    c, w, h = x.shape
    n = w * h

    xk = x.reshape(c, n).astype(jnp.float32)    # proj_key   (C, N)
    xq = jnp.transpose(xk)                      # proj_query (N, C)

    if tq is None:
        tq = _pick_query_tile(n)
    assert n % tq == 0, "query tile must divide W*H"

    att = pl.pallas_call(
        _cos_attn_kernel,
        out_shape=jax.ShapeDtypeStruct((n, n), jnp.float32),
        grid=(n // tq,),
        in_specs=[
            # (TQ, C) query row block; last dim == full C so no (8,128) issue.
            pl.BlockSpec((tq, c), lambda i: (i, 0)),
            # Full (C, N) key matrix, resident across all grid steps.
            pl.BlockSpec((c, n), lambda i: (0, 0)),
        ],
        out_specs=pl.BlockSpec((tq, n), lambda i: (i, 0)),
        compiler_params=pltpu.CompilerParams(
            dimension_semantics=("parallel",)),
    )(xq, xk)

    return att[None]  # (1, N, N) — the module folds the 3-D input to batch 1


def cos_attn_ref(x):
    """Pure-JAX transcription of the PyTorch forward."""
    c, w, h = x.shape
    n = w * h
    xb = x.reshape(1, c, n).astype(jnp.float32)
    q = jnp.transpose(xb, (0, 2, 1))                     # (1, N, C)
    k = xb                                               # (1, C, N)
    qn = jnp.sqrt(jnp.sum(q * q, axis=2))                # (1, N)  L2 over channels
    nm = qn[:, :, None] * qn[:, None, :]                 # (1, N, N)
    energy = jnp.einsum("bnc,bcm->bnm", q, k)            # (1, N, N)
    return jax.nn.softmax(energy / nm, axis=-1)


if __name__ == "__main__":
    C, W, H = 4, 16, 16                                  # small, module-consistent
    key = jax.random.PRNGKey(0)
    x = jax.random.normal(key, (C, W, H), dtype=jnp.float32)

    att = cos_attn(x)
    att = jax.block_until_ready(att)

    ref = cos_attn_ref(x)
    assert att.shape == (1, W * H, W * H), att.shape
    assert jnp.allclose(att, ref, rtol=1e-5, atol=1e-5), float(
        jnp.max(jnp.abs(att - ref)))
    # sanity: every attention row is a probability distribution
    assert jnp.allclose(jnp.sum(att, axis=-1), 1.0, rtol=1e-5, atol=1e-5)

    print("KERNEL_OK")
</pallas_src>

<mosaic_0001>
module attributes {stable_mosaic.version = 11 : i64} {
  func.func @_cos_attn_kernel(%arg0: i32, %arg1: memref<256x4xf32, #tpu.memory_space<vmem>>, %arg2: memref<4x256xf32, #tpu.memory_space<vmem>>, %arg3: memref<256x256xf32, #tpu.memory_space<vmem>>) attributes {dimension_semantics = [#tpu.dimension_semantics<parallel>], iteration_bounds = array<i64: 1>, scalar_prefetch = 0 : i64, scratch_operands = 0 : i64, tpu.core_type = #tpu.core_type<tc>, window_params = [{transform_indices = @transform_0, window_bounds = array<i64: 256, 4>}, {pipeline_mode = #tpu.pipeline_mode<synchronous>, transform_indices = @transform_1, window_bounds = array<i64: 4, 256>}, {transform_indices = @transform_2, window_bounds = array<i64: 256, 256>}]} {
    %c0 = arith.constant 0 : index
    %c0_0 = arith.constant 0 : index
    %0 = vector.load %arg1[%c0, %c0_0] : memref<256x4xf32, #tpu.memory_space<vmem>>, vector<256x4xf32>
    %c0_1 = arith.constant 0 : index
    %c0_2 = arith.constant 0 : index
    %1 = vector.load %arg2[%c0_1, %c0_2] : memref<4x256xf32, #tpu.memory_space<vmem>>, vector<4x256xf32>
    %cst = arith.constant dense<0.000000e+00> : vector<256x256xf32>
    %2 = tpu.matmul %0, %1, %cst {dimension_numbers = #tpu.dot_dimension_numbers<[1], [0], [0], [1], [0, 0, 1, 1], [], []>} : vector<256x4xf32>, vector<4x256xf32>, vector<256x256xf32> -> vector<256x256xf32>
    %3 = arith.mulf %0, %0 : vector<256x4xf32>
    %cst_3 = arith.constant dense<0.000000e+00> : vector<256xf32>
    %4 = vector.multi_reduction <add>, %3, %cst_3 [1] : vector<256x4xf32> to vector<256xf32>
    %5 = vector.shape_cast %4 : vector<256xf32> to vector<256x1xf32>
    %6 = math.rsqrt %5 : vector<256x1xf32>
    %7 = arith.mulf %1, %1 : vector<4x256xf32>
    %cst_4 = arith.constant dense<0.000000e+00> : vector<256xf32>
    %8 = vector.multi_reduction <add>, %7, %cst_4 [0] : vector<4x256xf32> to vector<256xf32>
    %9 = vector.shape_cast %8 : vector<256xf32> to vector<1x256xf32>
    %10 = math.rsqrt %9 : vector<1x256xf32>
    %11 = vector.broadcast %6 : vector<256x1xf32> to vector<256x256xf32>
    %12 = arith.mulf %2, %11 : vector<256x256xf32>
    %13 = vector.broadcast %10 : vector<1x256xf32> to vector<256x256xf32>
    %14 = arith.mulf %12, %13 : vector<256x256xf32>
    %cst_5 = arith.constant dense<0xFF800000> : vector<256xf32>
    %15 = vector.multi_reduction <maximumf>, %14, %cst_5 [1] : vector<256x256xf32> to vector<256xf32>
    %16 = vector.shape_cast %15 : vector<256xf32> to vector<256x1xf32>
    %17 = vector.broadcast %16 : vector<256x1xf32> to vector<256x256xf32>
    %18 = arith.subf %14, %17 : vector<256x256xf32>
    %19 = math.exp %18 : vector<256x256xf32>
    %cst_6 = arith.constant dense<0.000000e+00> : vector<256xf32>
    %20 = vector.multi_reduction <add>, %19, %cst_6 [1] : vector<256x256xf32> to vector<256xf32>
    %21 = vector.shape_cast %20 : vector<256xf32> to vector<256x1xf32>
    %cst_7 = arith.constant 1.000000e+00 : f32
    %22 = vector.broadcast %cst_7 : f32 to vector<256x1xf32>
    %23 = arith.divf %22, %21 : vector<256x1xf32>
    %24 = vector.broadcast %23 : vector<256x1xf32> to vector<256x256xf32>
    %25 = arith.mulf %19, %24 : vector<256x256xf32>
    %c0_8 = arith.constant 0 : index
    %c0_9 = arith.constant 0 : index
    %26 = vector.load %arg3[%c0_8, %c0_9] : memref<256x256xf32, #tpu.memory_space<vmem>>, vector<256x256xf32>
    tpu.vector_store %arg3[%c0_8, %c0_9], %25 {strides = array<i32>} : memref<256x256xf32, #tpu.memory_space<vmem>>, vector<256x256xf32>,
    return
  }
  func.func @transform_0(%arg0: i32) -> (i32, i32) {
    %c0_i32 = arith.constant 0 : i32
    %c0_i32_0 = arith.constant 0 : i32
    return %arg0, %c0_i32 : i32, i32
  }
  func.func @transform_1(%arg0: i32) -> (i32, i32) {
    %c0_i32 = arith.constant 0 : i32
    %c0_i32_0 = arith.constant 0 : i32
    %c0_i32_1 = arith.constant 0 : i32
    return %c0_i32, %c0_i32_0 : i32, i32
  }
  func.func @transform_2(%arg0: i32) -> (i32, i32) {
    %c0_i32 = arith.constant 0 : i32
    %c0_i32_0 = arith.constant 0 : i32
    return %arg0, %c0_i32 : i32, i32
  }
}

</mosaic_0001>

<bundles_post_ra>
// kernel: tpu_custom_call.1
= control target key start
LH: loop header
LB: loop body
LE: loop exit
PB: predicated region body
PF: predicated region fallthrough
CT: control target
= control target key end

     0   :  { %vm144_vm0 = vcmask 1043456   ;;  %v1629_v4 = vmov 0.0   ;;  %vm47_vm1 = vcmask 31744   ;;  %s2548_s0 = inlined_call_operand.vmem [shape: f32[256,4], index: 0, kind: input, shape index: {}]   ;;  %s2549_s1 = inlined_call_operand.vmem [shape: f32[4,256], index: 1, kind: input, shape index: {}]   ;;  %s2550_s2 = inlined_call_operand.hbm [shape: f32[256,256], index: 2, kind: output, shape index: {}]  }
   0x1   :  { %v44_v0 = vld [vmem:[%s2549_s1] sm:$0xff]  ;;  %213 = vmatprep.mubr.f32.mxu0 %v1629_v4  ;;  %309 = vmatprep.mubr.f32.mxu1 %v1629_v4  ;;  %v14_v5 = vld [vmem:[%s2548_s0 + $0x10] sm:$0xff]  ;;  %v13_v11 = vld [vmem:[%s2548_s0 + $0x8] sm:$0xff] }
   0x2   :  { %v12_v1 = vld [vmem:[%s2548_s0] sm:$0xff]  ;;  %v46_v2 = vcombine.high %v44_v0, %v44_v0  ;;  %v566_v3 = vmul.f32 %v44_v0, %v44_v0  ;;  %v408_v8 = vmul.f32 %v14_v5, %v14_v5  ;;  %v15_v12 = vld [vmem:[%s2548_s0 + $0x18] sm:$0xff]  ;;  %v407_v15 = vmul.f32 %v13_v11, %v13_v11  ;;  %v1690_v18 = vld [vmem:[%s2548_s0 + $0x88] sm:$0xff] }
   0x3   :  { %v406_v6 = vmul.f32 %v12_v1, %v12_v1  ;;  %v1662_v7 = vld [vmem:[%s2548_s0 + $0x80] sm:$0xff]  ;;  %v409_v16 = vmul.f32 %v15_v12, %v15_v12  ;;  %v17_v20 = vld [vmem:[%s2548_s0 + $0x28] sm:$0xff]  ;;  %v1706_v25 = vld [vmem:[%s2548_s0 + $0x30] sm:$0xff] }
   0x4   :  { %1306 = vmatprep.subr.msk.mxu0 %vm144_vm0, %v46_v2  ;;  %v568_v9 = vcombine.high %v566_v3, %v566_v3  ;;  %v1666_v10 = vsel %vm144_vm0, %v566_v3, 0.0  ;;  %1340 = vmatprep.subr.msk.mxu1 %vm144_vm0, %v46_v2  ;;  %v444_v14 = vsel %vm47_vm1, %v408_v8, 0.0  ;;  %v16_v19 = vld [vmem:[%s2548_s0 + $0x20] sm:$0xff]  ;;  %v441_v21 = vsel %vm47_vm1, %v407_v15, 0.0  ;;  %v1711_v26 = vld [vmem:[%s2548_s0 + $0x38] sm:$0xff]  ;;  %v1718_v27 = vld [vmem:[%s2548_s0 + $0x90] sm:$0xff] }
   0x5   :  { %1307 = vmatpush1.msk.msra.mxu0 %vm144_vm0, %v44_v0  ;;  %1341 = vmatpush1.msk.msra.mxu1 %vm144_vm0, %v44_v0  ;;  %v438_v13 = vsel %vm47_vm1, %v406_v6, 0.0  ;;  %v447_v22 = vsel %vm47_vm1, %v409_v16, 0.0  ;;  %v410_v23 = vmul.f32 %v16_v19, %v16_v19  ;;  %v411_v24 = vmul.f32 %v17_v20, %v17_v20 }
   0x6   :  { %v1680_v17 = vsel %vm144_vm0, %v568_v9, 0.0  ;;  %1308 = vmatmul.mubr.msk.f32.vlgmr.msra.gmra.mxu0 %vm47_vm1, %v12_v1  ;;  %1324 = vmatmul.mubr.msk.f32.vlgmr.msra.gmra.mxu1 %vm47_vm1, %v1662_v7 }
   0x7   :  { %219 = vmatprep.mubr.f32.mxu0 %v1629_v4  ;;  %315 = vmatprep.mubr.f32.mxu1 %v1629_v4 }
   0x8   :  { %439 = vadd.xlane.f32.xlu0 %v438_v13  ;;  %445 = vadd.xlane.f32.xlu1 %v444_v14 }
   0xa   :  { %1309 = vmatmul.mubr.msk.f32.gmra.mxu0 %vm47_vm1, %v13_v11  ;;  %1325 = vmatmul.mubr.msk.f32.gmra.mxu1 %vm47_vm1, %v1690_v18 }
   0xb   :  { %225 = vmatprep.mubr.f32.mxu0 %v1629_v4  ;;  %321 = vmatprep.mubr.f32.mxu1 %v1629_v4 }
   0xc   :  { %442 = vadd.xlane.f32.xlu0 %v441_v21  ;;  %448 = vadd.xlane.f32.xlu1 %v447_v22 }
   0xd   :  { %7 = vsyncpa [#allocation3], 0  ;;  %v450_v28 = vsel %vm47_vm1, %v410_v23, 0.0  ;;  %v453_v29 = vsel %vm47_vm1, %v411_v24, 0.0  ;;  %v412_v30 = vmul.f32 %v1706_v25, %v1706_v25  ;;  %v413_v31 = vmul.f32 %v1711_v26, %v1711_v26  ;;  %v1732_v32 = vld [vmem:[%s2548_s0 + $0x40] sm:$0xff]  ;;  %v1737_v33 = vld [vmem:[%s2548_s0 + $0x48] sm:$0xff] }
   0xe   :  { %1310 = vmatmul.mubr.msk.f32.gmra.mxu0 %vm47_vm1, %v14_v5  ;;  %1326 = vmatmul.mubr.msk.f32.gmra.mxu1 %vm47_vm1, %v1718_v27  ;;  %v1744_v34 = vld [vmem:[%s2548_s0 + $0x98] sm:$0xff]  ;;  %v414_v37 = vmul.f32 %v1732_v32, %v1732_v32  ;;  %v415_v38 = vmul.f32 %v1737_v33, %v1737_v33  ;;  %v1758_v39 = vld [vmem:[%s2548_s0 + $0x50] sm:$0xff]  ;;  %v1770_v41 = vld [vmem:[%s2548_s0 + $0xa0] sm:$0xff]  ;;  %v422_v63 = vmul.f32 %v1662_v7, %v1662_v7 }
   0xf   :  { %231 = vmatprep.mubr.f32.mxu0 %v1629_v4  ;;  %327 = vmatprep.mubr.f32.mxu1 %v1629_v4  ;;  %v456_v35 = vsel %vm47_vm1, %v412_v30, 0.0  ;;  %v459_v36 = vsel %vm47_vm1, %v413_v31, 0.0  ;;  %v1763_v40 = vld [vmem:[%s2548_s0 + $0x58] sm:$0xff]  ;;  %v416_v44 = vmul.f32 %v1758_v39, %v1758_v39  ;;  %v1784_v46 = vld [vmem:[%s2548_s0 + $0x60] sm:$0xff]  ;;  %v1789_v47 = vld [vmem:[%s2548_s0 + $0x68] sm:$0xff]  ;;  %v423_v0 = vmul.f32 %v1690_v18, %v1690_v18 }
  0x10   :  { %451 = vadd.xlane.f32.xlu0 %v450_v28  ;;  %454 = vadd.xlane.f32.xlu1 %v453_v29  ;;  %v462_v42 = vsel %vm47_vm1, %v414_v37, 0.0  ;;  %v465_v43 = vsel %vm47_vm1, %v415_v38, 0.0  ;;  %v417_v45 = vmul.f32 %v1763_v40, %v1763_v40  ;;  %v33_v48 = vld [vmem:[%s2548_s0 + $0xa8] sm:$0xff]  ;;  %v418_v51 = vmul.f32 %v1784_v46, %v1784_v46  ;;  %v1807_v53 = vld [vmem:[%s2548_s0 + $0x70] sm:$0xff]  ;;  %v1812_v54 = vld [vmem:[%s2548_s0 + $0x78] sm:$0xff] }
  0x11   :  { %v468_v49 = vsel %vm47_vm1, %v416_v44, 0.0  ;;  %v419_v52 = vmul.f32 %v1789_v47, %v1789_v47  ;;  %v34_v55 = vld [vmem:[%s2548_s0 + $0xb0] sm:$0xff]  ;;  %v420_v58 = vmul.f32 %v1807_v53, %v1807_v53  ;;  %v421_v59 = vmul.f32 %v1812_v54, %v1812_v54  ;;  %v35_v60 = vld [vmem:[%s2548_s0 + $0xb8] sm:$0xff]  ;;  %v36_v1 = vld [vmem:[%s2548_s0 + $0xc0] sm:$0xff] }
  0x12   :  { %1311 = vmatmul.mubr.msk.f32.gmra.mxu0 %vm47_vm1, %v15_v12  ;;  %1327 = vmatmul.mubr.msk.f32.gmra.mxu1 %vm47_vm1, %v1744_v34  ;;  %v471_v50 = vsel %vm47_vm1, %v417_v45, 0.0  ;;  %v474_v56 = vsel %vm47_vm1, %v418_v51, 0.0  ;;  %v486_v2 = vsel %vm47_vm1, %v422_v63, 0.0  ;;  %v489_v3 = vsel %vm47_vm1, %v423_v0, 0.0  ;;  %v37_v7 = vld [vmem:[%s2548_s0 + $0xc8] sm:$0xff]  ;;  %v38_v13 = vld [vmem:[%s2548_s0 + $0xd0] sm:$0xff] }
  0x13   :  { %237 = vmatprep.mubr.f32.mxu0 %v1629_v4  ;;  %333 = vmatprep.mubr.f32.mxu1 %v1629_v4  ;;  %v477_v57 = vsel %vm47_vm1, %v419_v52, 0.0  ;;  %v480_v61 = vsel %vm47_vm1, %v420_v58, 0.0  ;;  %v483_v62 = vsel %vm47_vm1, %v421_v59, 0.0  ;;  %v424_v5 = vmul.f32 %v1718_v27, %v1718_v27  ;;  %v40_v24 = vld [vmem:[%s2548_s0 + $0xe0] sm:$0xff]  ;;  %v41_v29 = vld [vmem:[%s2548_s0 + $0xe8] sm:$0xff] }
  0x14   :  { %457 = vadd.xlane.f32.xlu0 %v456_v35  ;;  %460 = vadd.xlane.f32.xlu1 %v459_v36  ;;  %v425_v6 = vmul.f32 %v1744_v34, %v1744_v34  ;;  %v426_v11 = vmul.f32 %v1770_v41, %v1770_v41  ;;  %v427_v12 = vmul.f32 %v33_v48, %v33_v48  ;;  %v42_v34 = vld [vmem:[%s2548_s0 + $0xf0] sm:$0xff]  ;;  %v43_v35 = vld [vmem:[%s2548_s0 + $0xf8] sm:$0xff]  ;;  %v578_v51 = vrot.slane %v1680_v17, 4 }
  0x15   :  { %v492_v8 = vsel %vm47_vm1, %v424_v5, 0.0  ;;  %v428_v16 = vmul.f32 %v34_v55, %v34_v55  ;;  %v429_v18 = vmul.f32 %v35_v60, %v35_v60  ;;  %v430_v22 = vmul.f32 %v36_v1, %v36_v1 }
  0x16   :  { %1312 = vmatmul.mubr.msk.f32.gmra.mxu0 %vm47_vm1, %v16_v19  ;;  %1328 = vmatmul.mubr.msk.f32.gmra.mxu1 %vm47_vm1, %v1770_v41  ;;  %v495_v9 = vsel %vm47_vm1, %v425_v6, 0.0  ;;  %v498_v14 = vsel %vm47_vm1, %v426_v11, 0.0  ;;  %v501_v15 = vsel %vm47_vm1, %v427_v12, 0.0  ;;  %v39_v19 = vld [vmem:[%s2548_s0 + $0xd8] sm:$0xff]  ;;  %v431_v23 = vmul.f32 %v37_v7, %v37_v7  ;;  %s1630_s0 = smov [#allocation2]  }
  0x17   :  { %243 = vmatprep.mubr.f32.mxu0 %v1629_v4  ;;  %339 = vmatprep.mubr.f32.mxu1 %v1629_v4  ;;  %v507_v21 = vsel %vm47_vm1, %v429_v18, 0.0  ;;  %v432_v27 = vmul.f32 %v38_v13, %v38_v13  ;;  %v433_v28 = vmul.f32 %v39_v19, %v39_v19  ;;  %v436_v38 = vmul.f32 %v42_v34, %v42_v34  ;;  %s1295_s16 = sshll.u32 %s1630_s0, 4  ;;  %s1296_s16 = int_to_ptr.vmem [resolvable:$true] %s1295_s16 }
  0x18   :  { %463 = vadd.xlane.f32.xlu0 %v462_v42  ;;  %466 = vadd.xlane.f32.xlu1 %v465_v43  ;;  %v571_v52 = vrot.slane %v1666_v10, 4  ;;  %s1607_s17 = scalar_lea.vmem %s1296_s16, 8192  ;;  %p1612_p1 = scmp.lt.s32.totalorder %s1296_s16, %s1296_s16 }
  0x19   :  { %v516_v30 = vsel %vm47_vm1, %v432_v27, 0.0  ;;  %v519_v31 = vsel %vm47_vm1, %v433_v28, 0.0  ;;  %p1608_p0 = scmp.ne.s32.totalorder %s1296_s16, %s1607_s17  ;;  %p1613_p2 = scmp.lt.s32.totalorder %s1607_s17, %s1607_s17 }
  0x1a   :  { %1313 = vmatmul.mubr.msk.f32.gmra.mxu0 %vm47_vm1, %v17_v20  ;;  %1329 = vmatmul.mubr.msk.f32.gmra.mxu1 %vm47_vm1, %v33_v48  ;;  %v504_v20 = vsel %vm47_vm1, %v428_v16, 0.0 }
  0x1b   :  { %249 = vmatprep.mubr.f32.mxu0 %v1629_v4  ;;  %345 = vmatprep.mubr.f32.mxu1 %v1629_v4  ;;  %p1614_p3 = por %p1613_p2, %p1612_p1 }
  0x1c   :  { %469 = vadd.xlane.f32.xlu0 %v468_v49  ;;  %472 = vadd.xlane.f32.xlu1 %v471_v50 }
  0x1d   :  { %p1615_p4 = pnand %p1614_p3, %p1608_p0 }
  0x1e   :  { %1314 = vmatmul.mubr.msk.f32.gmra.mxu0 %vm47_vm1, %v1706_v25  ;;  %1330 = vmatmul.mubr.msk.f32.gmra.mxu1 %vm47_vm1, %v34_v55  ;;  %v510_v25 = vsel %vm47_vm1, %v430_v22, 0.0  ;;  %v572_v55 = vadd.f32 %v571_v52, %v1666_v10 }
  0x1f   :  { %255 = vmatprep.mubr.f32.mxu0 %v1629_v4  ;;  %351 = vmatprep.mubr.f32.mxu1 %v1629_v4 }
  0x20   :  { %475 = vadd.xlane.f32.xlu0 %v474_v56  ;;  %478 = vadd.xlane.f32.xlu1 %v477_v57  ;;  %v573_v59 = vrot.slane %v572_v55, 2 }
  0x22   :  { %1315 = vmatmul.mubr.msk.f32.gmra.mxu0 %vm47_vm1, %v1711_v26  ;;  %1331 = vmatmul.mubr.msk.f32.gmra.mxu1 %vm47_vm1, %v35_v60  ;;  %v513_v26 = vsel %vm47_vm1, %v431_v23, 0.0 }
  0x23   :  { %261 = vmatprep.mubr.f32.mxu0 %v1629_v4  ;;  %357 = vmatprep.mubr.f32.mxu1 %v1629_v4 }
  0x24   :  { %481 = vadd.xlane.f32.xlu0 %v480_v61  ;;  %484 = vadd.xlane.f32.xlu1 %v483_v62  ;;  %v574_v62 = vadd.f32 %v573_v59, %v572_v55 }
  0x26   :  { %1316 = vmatmul.mubr.msk.f32.gmra.mxu0 %vm47_vm1, %v1732_v32  ;;  %1332 = vmatmul.mubr.msk.f32.gmra.mxu1 %vm47_vm1, %v36_v1  ;;  %v434_v32 = vmul.f32 %v40_v24, %v40_v24  ;;  %v575_v1 = vrot.slane %v574_v62, 1 }
  0x27   :  { %267 = vmatprep.mubr.f32.mxu0 %v1629_v4  ;;  %363 = vmatprep.mubr.f32.mxu1 %v1629_v4 }
  0x28   :  { %487 = vadd.xlane.f32.xlu0 %v486_v2  ;;  %490 = vadd.xlane.f32.xlu1 %v489_v3  ;;  %v522_v36 = vsel %vm47_vm1, %v434_v32, 0.0  ;;  %v576_v5 = vadd.f32 %v575_v1, %v574_v62 }
  0x2a   :  { %1317 = vmatmul.mubr.msk.f32.gmra.mxu0 %vm47_vm1, %v1737_v33  ;;  %1333 = vmatmul.mubr.msk.f32.gmra.mxu1 %vm47_vm1, %v37_v7  ;;  %v435_v33 = vmul.f32 %v41_v29, %v41_v29 }
  0x2b   :  { %273 = vmatprep.mubr.f32.mxu0 %v1629_v4  ;;  %369 = vmatprep.mubr.f32.mxu1 %v1629_v4 }
  0x2c   :  { %493 = vadd.xlane.f32.xlu0 %v492_v8  ;;  %496 = vadd.xlane.f32.xlu1 %v495_v9  ;;  %v525_v37 = vsel %vm47_vm1, %v435_v33, 0.0 }
  0x2e   :  { %1318 = vmatmul.mubr.msk.f32.gmra.mxu0 %vm47_vm1, %v1758_v39  ;;  %1334 = vmatmul.mubr.msk.f32.gmra.mxu1 %vm47_vm1, %v38_v13  ;;  %v437_v39 = vmul.f32 %v43_v35, %v43_v35 }
  0x2f   :  { %279 = vmatprep.mubr.f32.mxu0 %v1629_v4  ;;  %375 = vmatprep.mubr.f32.mxu1 %v1629_v4 }
  0x30   :  { %499 = vadd.xlane.f32.xlu0 %v498_v14  ;;  %502 = vadd.xlane.f32.xlu1 %v501_v15  ;;  %v531_v41 = vsel %vm47_vm1, %v437_v39, 0.0 }
  0x32   :  { %1319 = vmatmul.mubr.msk.f32.gmra.mxu0 %vm47_vm1, %v1763_v40  ;;  %1335 = vmatmul.mubr.msk.f32.gmra.mxu1 %vm47_vm1, %v39_v19  ;;  %v528_v40 = vsel %vm47_vm1, %v436_v38, 0.0 }
  0x33   :  { %285 = vmatprep.mubr.f32.mxu0 %v1629_v4  ;;  %381 = vmatprep.mubr.f32.mxu1 %v1629_v4 }
  0x34   :  { %505 = vadd.xlane.f32.xlu0 %v504_v20  ;;  %508 = vadd.xlane.f32.xlu1 %v507_v21 }
  0x36   :  { %1320 = vmatmul.mubr.msk.f32.gmra.mxu0 %vm47_vm1, %v1784_v46  ;;  %1336 = vmatmul.mubr.msk.f32.gmra.mxu1 %vm47_vm1, %v40_v24 }
  0x37   :  { %291 = vmatprep.mubr.f32.mxu0 %v1629_v4  ;;  %387 = vmatprep.mubr.f32.mxu1 %v1629_v4 }
  0x38   :  { %511 = vadd.xlane.f32.xlu0 %v510_v25  ;;  %514 = vadd.xlane.f32.xlu1 %v513_v26 }
  0x3a   :  { %1321 = vmatmul.mubr.msk.f32.gmra.mxu0 %vm47_vm1, %v1789_v47  ;;  %1337 = vmatmul.mubr.msk.f32.gmra.mxu1 %vm47_vm1, %v41_v29 }
  0x3b   :  { %297 = vmatprep.mubr.f32.mxu0 %v1629_v4  ;;  %393 = vmatprep.mubr.f32.mxu1 %v1629_v4 }
  0x3c   :  { %517 = vadd.xlane.f32.xlu0 %v516_v30  ;;  %520 = vadd.xlane.f32.xlu1 %v519_v31 }
  0x3e   :  { %1322 = vmatmul.mubr.msk.f32.gmra.mxu0 %vm47_vm1, %v1807_v53  ;;  %1338 = vmatmul.mubr.msk.f32.gmra.mxu1 %vm47_vm1, %v42_v34 }
  0x3f   :  { %303 = vmatprep.mubr.f32.mxu0 %v1629_v4  ;;  %399 = vmatprep.mubr.f32.mxu1 %v1629_v4 }
  0x40   :  { %523 = vadd.xlane.f32.xlu0 %v522_v36  ;;  %526 = vadd.xlane.f32.xlu1 %v525_v37 }
  0x42   :  { %1323 = vmatmul.mubr.msk.f32.gmra.mxu0 %vm47_vm1, %v1812_v54  ;;  %1339 = vmatmul.mubr.msk.f32.gmra.mxu1 %vm47_vm1, %v43_v35  ;;  %v579_v54 = vadd.f32 %v578_v51, %v1680_v17 }
  0x44   :  { %529 = vadd.xlane.f32.xlu0 %v528_v40  ;;  %532 = vadd.xlane.f32.xlu1 %v531_v41  ;;  %v580_v57 = vrot.slane %v579_v54, 2 }
  0x46   :  { %v581_v61 = vadd.f32 %v580_v57, %v579_v54 }
  0x48   :  { %v582_v0 = vrot.slane %v581_v61, 1 }
  0x4a   :  { %v583_v3 = vadd.f32 %v582_v0, %v581_v61 }
  0x91   :  { %v440_v42 = vpop.xlane.xlu0 %439  ;;  %v446_v43 = vpop.xlane.xlu1 %445 }
  0x92   :  { %1347 = vrsqrt.f32 %v440_v42 }
  0x95   :  { %v443_v44 = vpop.xlane.xlu0 %442  ;;  %v449_v45 = vpop.xlane.xlu1 %448 }
  0x99   :  { %v452_v46 = vpop.xlane.xlu0 %451  ;;  %v1928_v47 = vpop.xlane.xlu1 %454 }
  0x9d   :  { %v1930_v4 = vpop.xlane.xlu0 %457  ;;  %v1932_v48 = vpop.xlane.xlu1 %460 }
  0x9f   :  { %v1348_v9 = vpop.eup %1347 }
  0xa1   :  { %v1934_v49 = vpop.xlane.xlu0 %463  ;;  %v1936_v50 = vpop.xlane.xlu1 %466 }
  0xa5   :  { %v1940_v53 = vpop.xlane.xlu0 %469  ;;  %v1944_v56 = vpop.xlane.xlu1 %472 }
  0xa9   :  { %v1946_v58 = vpop.xlane.xlu0 %475  ;;  %v1948_v60 = vpop.xlane.xlu1 %478 }
  0xad   :  { %v1950_v63 = vpop.xlane.xlu0 %481  ;;  %v1952_v2 = vpop.xlane.xlu1 %484 }
  0xb1   :  { %v488_v17 = vpop.xlane.xlu0 %487  ;;  %v491_v10 = vpop.xlane.xlu1 %490 }
  0xb2   :  { %1349 = vrsqrt.f32 %v488_v17 }
  0xb3   :  { %1351 = vrsqrt.f32 %v583_v3 }
  0xb4   :  { %1353 = vrsqrt.f32 %v576_v5 }
  0xb5   :  { %1355 = vrsqrt.f32 %v491_v10  ;;  %v494_v6 = vpop.xlane.xlu0 %493  ;;  %v497_v7 = vpop.xlane.xlu1 %496 }
  0xb6   :  { %1357 = vrsqrt.f32 %v443_v44 }
  0xb7   :  { %1359 = vrsqrt.f32 %v494_v6 }
  0xb8   :  { %1361 = vrsqrt.f32 %v446_v43 }
  0xb9   :  { %1363 = vrsqrt.f32 %v449_v45  ;;  %v500_v8 = vpop.xlane.xlu0 %499  ;;  %v503_v21 = vpop.xlane.xlu1 %502 }
  0xba   :  { %1365 = vrsqrt.f32 %v497_v7 }
  0xbb   :  { %1367 = vrsqrt.f32 %v500_v8 }
  0xbc   :  { %1369 = vrsqrt.f32 %v452_v46 }
  0xbd   :  { %1371 = vrsqrt.f32 %v503_v21  ;;  %v506_v44 = vpop.xlane.xlu0 %505  ;;  %v509_v59 = vpop.xlane.xlu1 %508 }
  0xbe   :  { %1373 = vrsqrt.f32 %v1928_v47 }
  0xbf   :  { %v1350_v13 = vpop.eup %1349  ;;  %1375 = vrsqrt.f32 %v1930_v4 }
  0xc0   :  { %v1954_v14 = vpop.eup %1351  ;;  %1377 = vrsqrt.f32 %v506_v44 }
  0xc1   :  { %v1956_v19 = vpop.eup %1353  ;;  %1379 = vrsqrt.f32 %v1932_v48 }
  0xc2   :  { %v1356_v22 = vpop.eup %1355  ;;  %1381 = vrsqrt.f32 %v509_v59 }
  0xc3   :  { %v1358_v27 = vpop.eup %1357  ;;  %1383 = vrsqrt.f32 %v1934_v49 }
  0xc4   :  { %v1360_v36 = vpop.eup %1359 }
  0xc5   :  { %v1362_v42 = vpop.eup %1361 }
  0xc6   :  { %v215_v11 = vpop.f32.mrf.mxu0  ;;  %v311_v12 = vpop.f32.mrf.mxu1 }
  0xc7   :  { %v586_v15 = vmul.f32 %v1348_v9, %v215_v11  ;;  %v618_v23 = vmul.f32 %v1350_v13, %v311_v12  ;;  %v1364_v61 = vpop.eup %1363 }
  0xc8   :  { %v217_v16 = vpop.f32.mrf.mxu0  ;;  %v313_v18 = vpop.f32.mrf.mxu1 }
  0xc9   :  { %v587_v20 = vmul.f32 %v1348_v9, %v217_v16  ;;  %v619_v25 = vmul.f32 %v1350_v13, %v313_v18  ;;  %v1962_v29 = vmul.f32 %v1956_v19, %v586_v15  ;;  %v1966_v37 = vmul.f32 %v1956_v19, %v618_v23  ;;  %v1366_v17 = vpop.eup %1365  ;;  %v512_v13 = vpop.xlane.xlu0 %511 }
  0xca   :  { %v221_v24 = vpop.f32.mrf.mxu0  ;;  %v317_v26 = vpop.f32.mrf.mxu1  ;;  %1385 = vrsqrt.f32 %v512_v13 }
  0xcb   :  { %v1959_v28 = vmul.f32 %v1954_v14, %v587_v20  ;;  %v588_v30 = vmul.f32 %v1358_v27, %v221_v24  ;;  %v620_v33 = vmul.f32 %v1356_v22, %v317_v26  ;;  %v1969_v38 = vmul.f32 %v1954_v14, %v619_v25  ;;  %v1368_v15 = vpop.eup %1367 }
  0xcc   :  { %v223_v31 = vpop.f32.mrf.mxu0  ;;  %v319_v32 = vpop.f32.mrf.mxu1  ;;  %1387 = vrsqrt.f32 %v1936_v50 }
  0xcd   :  { %v589_v34 = vmul.f32 %v1358_v27, %v223_v31  ;;  %v621_v35 = vmul.f32 %v1356_v22, %v319_v32  ;;  %v714_v40 = vmax.f32 %v1962_v29, %v1959_v28  ;;  %v1978_v45 = vmul.f32 %v1956_v19, %v588_v30  ;;  %v1370_v23 = vpop.eup %1369 }
  0xce   :  { %v227_v39 = vpop.f32.mrf.mxu0  ;;  %v323_v41 = vpop.f32.mrf.mxu1  ;;  %v1981_v52 = vmul.f32 %v1956_v19, %v620_v33  ;;  %v762_v4 = vmax.f32 %v1966_v37, %v1969_v38 }
  0xcf   :  { %v1974_v43 = vmul.f32 %v1954_v14, %v589_v34  ;;  %v590_v46 = vmul.f32 %v1362_v42, %v227_v39  ;;  %715 = vmax.xlane.f32.xlu0 %v714_v40  ;;  %v1984_v54 = vmul.f32 %v1954_v14, %v621_v35  ;;  %v622_v55 = vmul.f32 %v1360_v36, %v323_v41  ;;  %v1372_v34 = vpop.eup %1371 }
  0xd0   :  { %v229_v47 = vpop.f32.mrf.mxu0  ;;  %v325_v51 = vpop.f32.mrf.mxu1 }
  0xd1   :  { %v591_v57 = vmul.f32 %v1362_v42, %v229_v47  ;;  %v623_v0 = vmul.f32 %v1360_v36, %v325_v51  ;;  %v717_v1 = vmax.f32 %v1978_v45, %v1974_v43  ;;  %v1995_v10 = vmul.f32 %v1956_v19, %v590_v46  ;;  %v1374_v42 = vpop.eup %1373  ;;  %v515_v46 = vpop.xlane.xlu1 %514 }
  0xd2   :  { %v233_v62 = vpop.f32.mrf.mxu0  ;;  %v329_v3 = vpop.f32.mrf.mxu1  ;;  %v1998_v9 = vmul.f32 %v1956_v19, %v622_v55  ;;  %v765_v12 = vmax.f32 %v1981_v52, %v1984_v54  ;;  %1389 = vrsqrt.f32 %v515_v46 }
  0xd3   :  { %v1991_v5 = vmul.f32 %v1954_v14, %v591_v57  ;;  %v592_v6 = vmul.f32 %v1364_v61, %v233_v62  ;;  %763 = vmax.xlane.f32.xlu0 %v762_v4  ;;  %718 = vmax.xlane.f32.xlu1 %v717_v1  ;;  %v2003_v48 = vmul.f32 %v1954_v14, %v623_v0  ;;  %v1376_v59 = vpop.eup %1375  ;;  %v518_v1 = vpop.xlane.xlu0 %517  ;;  %1391 = vrsqrt.f32 %v1940_v53 }
  0xd4   :  { %v235_v7 = vpop.f32.mrf.mxu0  ;;  %v331_v8 = vpop.f32.mrf.mxu1  ;;  %v624_v16 = vmul.f32 %v1366_v17, %v329_v3  ;;  %1393 = vrsqrt.f32 %v518_v1 }
  0xd5   :  { %v593_v11 = vmul.f32 %v1364_v61, %v235_v7  ;;  %v625_v20 = vmul.f32 %v1366_v17, %v331_v8  ;;  %v720_v21 = vmax.f32 %v1995_v10, %v1991_v5  ;;  %v2012_v25 = vmul.f32 %v1956_v19, %v592_v6  ;;  %v1378_v8 = vpop.eup %1377 }
  0xd6   :  { %v239_v18 = vpop.f32.mrf.mxu0  ;;  %v335_v22 = vpop.f32.mrf.mxu1  ;;  %v2015_v35 = vmul.f32 %v1956_v19, %v624_v16  ;;  %v768_v39 = vmax.f32 %v1998_v9, %v2003_v48  ;;  %1395 = vrsqrt.f32 %v1944_v56 }
  0xd7   :  { %v2008_v24 = vmul.f32 %v1954_v14, %v593_v11  ;;  %v594_v26 = vmul.f32 %v1370_v23, %v239_v18  ;;  %766 = vmax.xlane.f32.xlu1 %v765_v12  ;;  %721 = vmax.xlane.f32.xlu0 %v720_v21  ;;  %v626_v31 = vmul.f32 %v1368_v15, %v335_v22  ;;  %v1380_v18 = vpop.eup %1379 }
  0xd8   :  { %v241_v27 = vpop.f32.mrf.mxu0  ;;  %v337_v30 = vpop.f32.mrf.mxu1  ;;  %v2018_v36 = vmul.f32 %v1954_v14, %v625_v20 }
  0xd9   :  { %v595_v32 = vmul.f32 %v1370_v23, %v241_v27  ;;  %v627_v33 = vmul.f32 %v1368_v15, %v337_v30  ;;  %v723_v40 = vmax.f32 %v2012_v25, %v2008_v24  ;;  %v2029_v47 = vmul.f32 %v1956_v19, %v594_v26  ;;  %v521_v23 = vpop.xlane.xlu1 %520  ;;  %v1382_v26 = vpop.eup %1381 }
  0xda   :  { %v245_v49 = vpop.f32.mrf.mxu0  ;;  %v341_v41 = vpop.f32.mrf.mxu1  ;;  %v2032_v61 = vmul.f32 %v1956_v19, %v626_v31  ;;  %v771_v17 = vmax.f32 %v2015_v35, %v2018_v36  ;;  %1397 = vrsqrt.f32 %v521_v23 }
  0xdb   :  { %v2025_v44 = vmul.f32 %v1954_v14, %v595_v32  ;;  %v596_v51 = vmul.f32 %v1374_v42, %v245_v49  ;;  %769 = vmax.xlane.f32.xlu0 %v768_v39  ;;  %724 = vmax.xlane.f32.xlu1 %v723_v40  ;;  %v2035_v62 = vmul.f32 %v1954_v14, %v627_v33  ;;  %1399 = vrsqrt.f32 %v1946_v58 }
  0xdc   :  { %v247_v55 = vpop.f32.mrf.mxu0  ;;  %v343_v57 = vpop.f32.mrf.mxu1  ;;  %v628_v0 = vmul.f32 %v1372_v34, %v341_v41 }
  0xdd   :  { %v597_v4 = vmul.f32 %v1374_v42, %v247_v55  ;;  %v629_v50 = vmul.f32 %v1372_v34, %v343_v57  ;;  %v726_v6 = vmax.f32 %v2029_v47, %v2025_v44  ;;  %v2046_v12 = vmul.f32 %v1956_v19, %v596_v51  ;;  %v1384_v42 = vpop.eup %1383  ;;  %v527_v23 = vpop.xlane.xlu1 %526 }
  0xde   :  { %v251_v3 = vpop.f32.mrf.mxu0  ;;  %v347_v7 = vpop.f32.mrf.mxu1  ;;  %v2049_v20 = vmul.f32 %v1956_v19, %v628_v0  ;;  %v774_v22 = vmax.f32 %v2032_v61, %v2035_v62 }
  0xdf   :  { %v2042_v11 = vmul.f32 %v1954_v14, %v597_v4  ;;  %v598_v13 = vmul.f32 %v1376_v59, %v251_v3  ;;  %772 = vmax.xlane.f32.xlu1 %v771_v17  ;;  %727 = vmax.xlane.f32.xlu0 %v726_v6  ;;  %v2054_v53 = vmul.f32 %v1954_v14, %v629_v50  ;;  %v1386_v57 = vpop.eup %1385  ;;  %v524_v17 = vpop.xlane.xlu0 %523 }
  0xe0   :  { %v253_v15 = vpop.f32.mrf.mxu0  ;;  %v349_v16 = vpop.f32.mrf.mxu1  ;;  %v630_v27 = vmul.f32 %v1378_v8, %v347_v7  ;;  %1401 = vrsqrt.f32 %v524_v17 }
  0xe1   :  { %v599_v21 = vmul.f32 %v1376_v59, %v253_v15  ;;  %v631_v31 = vmul.f32 %v1378_v8, %v349_v16  ;;  %v729_v32 = vmax.f32 %v2046_v12, %v2042_v11  ;;  %v2063_v49 = vmul.f32 %v1956_v19, %v598_v13  ;;  %v1388_v15 = vpop.eup %1387 }
  0xe2   :  { %v257_v30 = vpop.f32.mrf.mxu0  ;;  %v353_v33 = vpop.f32.mrf.mxu1  ;;  %v2066_v59 = vmul.f32 %v1956_v19, %v630_v27  ;;  %v777_v4 = vmax.f32 %v2049_v20, %v2054_v53  ;;  %1403 = vrsqrt.f32 %v1948_v60 }
  0xe3   :  { %v2059_v34 = vmul.f32 %v1954_v14, %v599_v21  ;;  %v600_v39 = vmul.f32 %v1380_v18, %v257_v30  ;;  %775 = vmax.xlane.f32.xlu0 %v774_v22  ;;  %730 = vmax.xlane.f32.xlu1 %v729_v32  ;;  %v632_v46 = vmul.f32 %v1382_v26, %v353_v33  ;;  %v1390_v32 = vpop.eup %1389  ;;  %1405 = vrsqrt.f32 %v527_v23 }
  0xe4   :  { %v259_v40 = vpop.f32.mrf.mxu0  ;;  %v355_v41 = vpop.f32.mrf.mxu1  ;;  %v2069_v0 = vmul.f32 %v1954_v14, %v631_v31  ;;  %1407 = vrsqrt.f32 %v1950_v63 }
  0xe5   :  { %v601_v51 = vmul.f32 %v1380_v18, %v259_v40  ;;  %v633_v55 = vmul.f32 %v1382_v26, %v355_v41  ;;  %v732_v1 = vmax.f32 %v2063_v49, %v2059_v34  ;;  %v2080_v6 = vmul.f32 %v1956_v19, %v600_v39 }
  0xe6   :  { %v263_v56 = vpop.f32.mrf.mxu0  ;;  %v359_v3 = vpop.f32.mrf.mxu1  ;;  %v2083_v16 = vmul.f32 %v1956_v19, %v632_v46  ;;  %v780_v27 = vmax.f32 %v2066_v59, %v2069_v0 }
  0xe7   :  { %v2076_v50 = vmul.f32 %v1954_v14, %v601_v51  ;;  %v602_v7 = vmul.f32 %v1384_v42, %v263_v56  ;;  %778 = vmax.xlane.f32.xlu1 %v777_v4  ;;  %733 = vmax.xlane.f32.xlu0 %v732_v1  ;;  %v2086_v18 = vmul.f32 %v1954_v14, %v633_v55  ;;  %v1392_v46 = vpop.eup %1391  ;;  %v530_v56 = vpop.xlane.xlu0 %529 }
  0xe8   :  { %v265_v8 = vpop.f32.mrf.mxu0  ;;  %v361_v13 = vpop.f32.mrf.mxu1  ;;  %v634_v21 = vmul.f32 %v1386_v57, %v359_v3  ;;  %1409 = vrsqrt.f32 %v530_v56 }
  0xe9   :  { %v603_v22 = vmul.f32 %v1384_v42, %v265_v8  ;;  %v635_v58 = vmul.f32 %v1386_v57, %v361_v13  ;;  %v735_v30 = vmax.f32 %v2080_v6, %v2076_v50  ;;  %v2097_v39 = vmul.f32 %v1956_v19, %v602_v7  ;;  %v1394_v4 = vpop.eup %1393 }
  0xea   :  { %v269_v26 = vpop.f32.mrf.mxu0  ;;  %v365_v31 = vpop.f32.mrf.mxu1  ;;  %v2100_v51 = vmul.f32 %v1956_v19, %v634_v21  ;;  %v783_v57 = vmax.f32 %v2083_v16, %v2086_v18  ;;  %1411 = vrsqrt.f32 %v1952_v2 }
  0xeb   :  { %v2093_v33 = vmul.f32 %v1954_v14, %v603_v22  ;;  %v604_v40 = vmul.f32 %v1388_v15, %v269_v26  ;;  %781 = vmax.xlane.f32.xlu0 %v780_v27  ;;  %736 = vmax.xlane.f32.xlu1 %v735_v30  ;;  %v2105_v60 = vmul.f32 %v1954_v14, %v635_v58  ;;  %v1396_v26 = vpop.eup %1395 }
  0xec   :  { %v271_v41 = vpop.f32.mrf.mxu0  ;;  %v367_v42 = vpop.f32.mrf.mxu1  ;;  %v636_v1 = vmul.f32 %v1390_v32, %v365_v31 }
  0xed   :  { %v605_v55 = vmul.f32 %v1388_v15, %v271_v41  ;;  %v637_v17 = vmul.f32 %v1390_v32, %v367_v42  ;;  %v738_v7 = vmax.f32 %v2097_v39, %v2093_v33  ;;  %v2114_v15 = vmul.f32 %v1956_v19, %v604_v40  ;;  %v1398_v31 = vpop.eup %1397 }
  0xee   :  { %v275_v3 = vpop.f32.mrf.mxu0  ;;  %v371_v8 = vpop.f32.mrf.mxu1  ;;  %v2117_v32 = vmul.f32 %v1956_v19, %v636_v1  ;;  %v786_v40 = vmax.f32 %v2100_v51, %v2105_v60 }
  0xef   :  { %v2110_v13 = vmul.f32 %v1954_v14, %v605_v55  ;;  %v606_v21 = vmul.f32 %v1392_v46, %v275_v3  ;;  %784 = vmax.xlane.f32.xlu1 %v783_v57  ;;  %739 = vmax.xlane.f32.xlu0 %v738_v7  ;;  %v638_v58 = vmul.f32 %v1394_v4, %v371_v8 }
  0xf0   :  { %v277_v22 = vpop.f32.mrf.mxu0  ;;  %v373_v23 = vpop.f32.mrf.mxu1  ;;  %2579 = vst [vmem:[#allocation6_spill] sm:$0xff] %v2117_v32  ;;  %v2120_v41 = vmul.f32 %v1954_v14, %v637_v17 }
  0xf1   :  { %2578 = vst [vmem:[#allocation5_spill] sm:$0xff] %v2110_v13  ;;  %v607_v27 = vmul.f32 %v1392_v46, %v277_v22  ;;  %v639_v30 = vmul.f32 %v1394_v4, %v373_v23  ;;  %v741_v42 = vmax.f32 %v2114_v15, %v2110_v13  ;;  %v533_v46 = vpop.xlane.xlu1 %532  ;;  %v2131_v56 = vmul.f32 %v1956_v19, %v606_v21  ;;  %v1400_v17 = vpop.eup %1399 }
  0xf2   :  { %2580 = vst [vmem:[#allocation7_spill] sm:$0xff] %v2120_v41  ;;  %v281_v63 = vpop.f32.mrf.mxu0  ;;  %v377_v55 = vpop.f32.mrf.mxu1  ;;  %v2134_v7 = vmul.f32 %v1956_v19, %v638_v58  ;;  %v789_v2 = vmax.f32 %v2117_v32, %v2120_v41  ;;  %1413 = vrsqrt.f32 %v533_v46 }
  0xf3   :  { %v2127_v57 = vmul.f32 %v1954_v14, %v607_v27  ;;  %2582 = vst [vmem:[#allocation9_spill] sm:$0xff] %v2131_v56  ;;  %v608_v4 = vmul.f32 %v1396_v26, %v281_v63  ;;  %787 = vmax.xlane.f32.xlu0 %v786_v40  ;;  %742 = vmax.xlane.f32.xlu1 %v741_v42  ;;  %v1402_v40 = vpop.eup %1401 }
  0xf4   :  { %v283_v1 = vpop.f32.mrf.mxu0  ;;  %v379_v3 = vpop.f32.mrf.mxu1  ;;  %2583 = vst [vmem:[#allocation10_spill] sm:$0xff] %v2134_v7  ;;  %v2137_v8 = vmul.f32 %v1954_v14, %v639_v30  ;;  %v640_v22 = vmul.f32 %v1398_v31, %v377_v55 }
  0xf5   :  { %2581 = vst [vmem:[#allocation8_spill] sm:$0xff] %v2127_v57  ;;  %v609_v23 = vmul.f32 %v1396_v26, %v283_v1  ;;  %v641_v13 = vmul.f32 %v1398_v31, %v379_v3  ;;  %v744_v21 = vmax.f32 %v2131_v56, %v2127_v57  ;;  %v2147_v58 = vmul.f32 %v1956_v19, %v608_v4  ;;  %v1404_v55 = vpop.eup %1403 }
  0xf6   :  { %2584 = vst [vmem:[#allocation11_spill] sm:$0xff] %v2137_v8  ;;  %v287_v27 = vpop.f32.mrf.mxu0  ;;  %v383_v63 = vpop.f32.mrf.mxu1  ;;  %v2150_v1 = vmul.f32 %v1956_v19, %v640_v22  ;;  %v792_v46 = vmax.f32 %v2134_v7, %v2137_v8 }
  0xf7   :  { %v2144_v42 = vmul.f32 %v1954_v14, %v609_v23  ;;  %2586 = vst [vmem:[#allocation13_spill] sm:$0xff] %v2147_v58  ;;  %v610_v30 = vmul.f32 %v1400_v17, %v287_v27  ;;  %790 = vmax.xlane.f32.xlu1 %v789_v2  ;;  %745 = vmax.xlane.f32.xlu0 %v744_v21  ;;  %v1406_v57 = vpop.eup %1405 }
  0xf8   :  { %v289_v26 = vpop.f32.mrf.mxu0  ;;  %v385_v31 = vpop.f32.mrf.mxu1  ;;  %2587 = vst [vmem:[#allocation14_spill] sm:$0xff] %v2150_v1  ;;  %v2155_v23 = vmul.f32 %v1954_v14, %v641_v13  ;;  %v642_v56 = vmul.f32 %v1402_v40, %v383_v63 }
  0xf9   :  { %2585 = vst [vmem:[#allocation12_spill] sm:$0xff] %v2144_v42  ;;  %v611_v3 = vmul.f32 %v1400_v17, %v289_v26  ;;  %v643_v41 = vmul.f32 %v1402_v40, %v385_v31  ;;  %v747_v27 = vmax.f32 %v2147_v58, %v2144_v42  ;;  %v2163_v22 = vmul.f32 %v1956_v19, %v610_v30  ;;  %v1408_v13 = vpop.eup %1407 }
  0xfa   :  { %2588 = vst [vmem:[#allocation15_spill] sm:$0xff] %v2155_v23  ;;  %v293_v4 = vpop.f32.mrf.mxu0  ;;  %v389_v2 = vpop.f32.mrf.mxu1  ;;  %v2166_v31 = vmul.f32 %v1956_v19, %v642_v56  ;;  %v795_v30 = vmax.f32 %v2150_v1, %v2155_v23 }
  0xfb   :  { %v2160_v21 = vmul.f32 %v1954_v14, %v611_v3  ;;  %2590 = vst [vmem:[#allocation17_spill] sm:$0xff] %v2163_v22  ;;  %v612_v17 = vmul.f32 %v1404_v55, %v293_v4  ;;  %793 = vmax.xlane.f32.xlu0 %v792_v46  ;;  %748 = vmax.xlane.f32.xlu1 %v747_v27  ;;  %v1410_v40 = vpop.eup %1409 }
  0xfc   :  { %v295_v26 = vpop.f32.mrf.mxu0  ;;  %v391_v8 = vpop.f32.mrf.mxu1  ;;  %v644_v63 = vmul.f32 %v1406_v57, %v389_v2  ;;  %v2169_v42 = vmul.f32 %v1954_v14, %v643_v41 }
  0xfd   :  { %2589 = vst [vmem:[#allocation16_spill] sm:$0xff] %v2160_v21  ;;  %v613_v7 = vmul.f32 %v1404_v55, %v295_v26  ;;  %v645_v32 = vmul.f32 %v1406_v57, %v391_v8  ;;  %v750_v46 = vmax.f32 %v2163_v22, %v2160_v21  ;;  %v2179_v57 = vmul.f32 %v1956_v19, %v612_v17  ;;  %v1412_v55 = vpop.eup %1411 }
  0xfe   :  { %v299_v3 = vpop.f32.mrf.mxu0  ;;  %v395_v4 = vpop.f32.mrf.mxu1  ;;  %v2182_v2 = vmul.f32 %v1956_v19, %v644_v63  ;;  %v798_v17 = vmax.f32 %v2166_v31, %v2169_v42 }
  0xff   :  { %v2176_v27 = vmul.f32 %v1954_v14, %v613_v7  ;;  %v614_v8 = vmul.f32 %v1408_v13, %v299_v3  ;;  %796 = vmax.xlane.f32.xlu1 %v795_v30  ;;  %751 = vmax.xlane.f32.xlu0 %v750_v46  ;;  %v2185_v26 = vmul.f32 %v1954_v14, %v645_v32  ;;  %v1414_v46 = vpop.eup %1413 }
 0x100   :  { %v301_v56 = vpop.f32.mrf.mxu0  ;;  %v397_v41 = vpop.f32.mrf.mxu1  ;;  %v646_v22 = vmul.f32 %v1410_v40, %v395_v4 }
 0x101   :  { %2591 = vst [vmem:[#allocation18_spill] sm:$0xff] %v2176_v27  ;;  %v615_v21 = vmul.f32 %v1408_v13, %v301_v56  ;;  %v647_v7 = vmul.f32 %v1410_v40, %v397_v41  ;;  %v753_v3 = vmax.f32 %v2179_v57, %v2176_v27  ;;  %v2195_v58 = vmul.f32 %v1956_v19, %v614_v8 }
 0x102   :  { %v305_v23 = vpop.f32.mrf.mxu0  ;;  %v401_v30 = vpop.f32.mrf.mxu1  ;;  %v2198_v40 = vmul.f32 %v1956_v19, %v646_v22  ;;  %v801_v56 = vmax.f32 %v2182_v2, %v2185_v26 }
 0x103   :  { %v2192_v1 = vmul.f32 %v1954_v14, %v615_v21  ;;  %v616_v63 = vmul.f32 %v1412_v55, %v305_v23  ;;  %799 = vmax.xlane.f32.xlu0 %v798_v17  ;;  %754 = vmax.xlane.f32.xlu1 %v753_v3  ;;  %v2203_v41 = vmul.f32 %v1954_v14, %v647_v7 }
 0x104   :  { %v307_v32 = vpop.f32.mrf.mxu0  ;;  %v403_v13 = vpop.f32.mrf.mxu1  ;;  %v648_v21 = vmul.f32 %v1414_v46, %v401_v30 }
 0x105   :  { %v617_v4 = vmul.f32 %v1412_v55, %v307_v32  ;;  %v649_v27 = vmul.f32 %v1414_v46, %v403_v13  ;;  %v756_v23 = vmax.f32 %v2195_v58, %v2192_v1  ;;  %v2208_v8 = vmul.f32 %v1956_v19, %v616_v63 }
 0x106   :  { %v2216_v55 = vmul.f32 %v1956_v19, %v648_v21  ;;  %v804_v3 = vmax.f32 %v2198_v40, %v2203_v41 }
 0x107   :  { %v2211_v17 = vmul.f32 %v1954_v14, %v617_v4  ;;  %802 = vmax.xlane.f32.xlu1 %v801_v56  ;;  %757 = vmax.xlane.f32.xlu0 %v756_v23  ;;  %v2219_v7 = vmul.f32 %v1954_v14, %v649_v27 }
 0x109   :  { %v759_v22 = vmax.f32 %v2208_v8, %v2211_v17  ;;  %2592 = vst [vmem:[#allocation19_spill] sm:$0xff] %v2219_v7  ;;  %v807_v30 = vmax.f32 %v2216_v55, %v2219_v7 }
 0x10b   :  { %805 = vmax.xlane.f32.xlu0 %v804_v3  ;;  %760 = vmax.xlane.f32.xlu1 %v759_v22 }
 0x10f   :  { %808 = vmax.xlane.f32.xlu1 %v807_v30 }
 0x158   :  { %v716_v46 = vpop.xlane.xlu0 %715 }
 0x159   :  { %v810_v63 = vsub.f32 %v1962_v29, %v716_v46  ;;  %v811_v32 = vsub.f32 %v1959_v28, %v716_v46 }
 0x15b   :  { %v874_v13 = vmul.f32 1.442695, %v810_v63  ;;  %v876_v19 = vmul.f32 1.442695, %v811_v32 }
 0x15c   :  { %v764_v4 = vpop.xlane.xlu0 %763  ;;  %v719_v56 = vpop.xlane.xlu1 %718 }
 0x15d   :  { %1415 = vpow2.f32 %v874_v13  ;;  %v842_v14 = vsub.f32 %v1966_v37, %v764_v4  ;;  %v843_v27 = vsub.f32 %v1969_v38, %v764_v4  ;;  %v812_v21 = vsub.f32 %v1978_v45, %v719_v56 }
 0x15e   :  { %1417 = vpow2.f32 %v876_v19  ;;  %v813_v23 = vsub.f32 %v1974_v43, %v719_v56 }
 0x15f   :  { %v938_v22 = vmul.f32 1.442695, %v842_v14  ;;  %v940_v3 = vmul.f32 1.442695, %v843_v27  ;;  %v878_v30 = vmul.f32 1.442695, %v812_v21 }
 0x160   :  { %v880_v29 = vmul.f32 1.442695, %v813_v23  ;;  %v767_v7 = vpop.xlane.xlu1 %766  ;;  %v722_v28 = vpop.xlane.xlu0 %721 }
 0x161   :  { %1419 = vpow2.f32 %v938_v22  ;;  %v844_v46 = vsub.f32 %v1981_v52, %v767_v7  ;;  %v845_v63 = vsub.f32 %v1984_v54, %v767_v7  ;;  %v814_v37 = vsub.f32 %v1995_v10, %v722_v28 }
 0x162   :  { %1421 = vpow2.f32 %v940_v3  ;;  %v815_v38 = vsub.f32 %v1991_v5, %v722_v28 }
 0x163   :  { %1423 = vpow2.f32 %v878_v30  ;;  %v942_v45 = vmul.f32 1.442695, %v844_v46  ;;  %v944_v32 = vmul.f32 1.442695, %v845_v63  ;;  %v882_v43 = vmul.f32 1.442695, %v814_v37 }
 0x164   :  { %1425 = vpow2.f32 %v880_v29  ;;  %v884_v13 = vmul.f32 1.442695, %v815_v38  ;;  %v770_v19 = vpop.xlane.xlu0 %769  ;;  %v725_v4 = vpop.xlane.xlu1 %724 }
 0x165   :  { %1427 = vpow2.f32 %v942_v45  ;;  %v846_v56 = vsub.f32 %v1998_v9, %v770_v19  ;;  %v847_v52 = vsub.f32 %v2003_v48, %v770_v19  ;;  %v816_v54 = vsub.f32 %v2012_v25, %v725_v4 }
 0x166   :  { %1429 = vpow2.f32 %v944_v32  ;;  %v817_v10 = vsub.f32 %v2008_v24, %v725_v4 }
 0x167   :  { %1431 = vpow2.f32 %v882_v43  ;;  %v946_v5 = vmul.f32 1.442695, %v846_v56  ;;  %v948_v7 = vmul.f32 1.442695, %v847_v52  ;;  %v886_v14 = vmul.f32 1.442695, %v816_v54 }
 0x168   :  { %1433 = vpow2.f32 %v884_v13  ;;  %v888_v27 = vmul.f32 1.442695, %v817_v10  ;;  %v773_v21 = vpop.xlane.xlu1 %772  ;;  %v728_v23 = vpop.xlane.xlu0 %727 }
 0x169   :  { %1435 = vpow2.f32 %v946_v5  ;;  %v848_v22 = vsub.f32 %v2015_v35, %v773_v21  ;;  %v849_v9 = vsub.f32 %v2018_v36, %v773_v21  ;;  %v818_v48 = vsub.f32 %v2029_v47, %v728_v23 }
 0x16a   :  { %v2242_v3 = vpop.eup %1415  ;;  %1437 = vpow2.f32 %v948_v7  ;;  %v819_v24 = vsub.f32 %v2025_v44, %v728_v23 }
 0x16b   :  { %v2245_v25 = vpop.eup %1417  ;;  %1439 = vpow2.f32 %v886_v14  ;;  %v950_v30 = vmul.f32 1.442695, %v848_v22  ;;  %v952_v29 = vmul.f32 1.442695, %v849_v9  ;;  %v890_v28 = vmul.f32 1.442695, %v818_v48 }
 0x16c   :  { %1441 = vpow2.f32 %v888_v27  ;;  %v892_v46 = vmul.f32 1.442695, %v819_v24  ;;  %v776_v63 = vpop.xlane.xlu0 %775  ;;  %v731_v37 = vpop.xlane.xlu1 %730  ;;  %v1002_v35 = vadd.f32 %v2245_v25, %v2242_v3 }
 0x16d   :  { %1443 = vpow2.f32 %v950_v30  ;;  %v850_v36 = vsub.f32 %v2032_v61, %v776_v63  ;;  %v851_v47 = vsub.f32 %v2035_v62, %v776_v63  ;;  %v820_v44 = vsub.f32 %v2046_v12, %v731_v37 }
 0x16e   :  { %v2252_v38 = vpop.eup %1419  ;;  %1445 = vpow2.f32 %v952_v29  ;;  %v821_v45 = vsub.f32 %v2042_v11, %v731_v37  ;;  %1003 = vadd.xlane.f32.xlu0 %v1002_v35 }
 0x16f   :  { %v2255_v32 = vpop.eup %1421  ;;  %1447 = vpow2.f32 %v890_v28  ;;  %v954_v43 = vmul.f32 1.442695, %v850_v36  ;;  %v956_v13 = vmul.f32 1.442695, %v851_v47  ;;  %v894_v19 = vmul.f32 1.442695, %v820_v44 }
 0x170   :  { %v2257_v4 = vpop.eup %1423  ;;  %1449 = vpow2.f32 %v892_v46  ;;  %v896_v61 = vmul.f32 1.442695, %v821_v45  ;;  %v779_v56 = vpop.xlane.xlu1 %778  ;;  %v1050_v12 = vadd.f32 %v2255_v32, %v2252_v38 }
 0x171   :  { %v734_v62 = vpop.xlane.xlu0 %733  ;;  %v2261_v52 = vpop.eup %1425  ;;  %1451 = vpow2.f32 %v954_v43  ;;  %v852_v11 = vsub.f32 %v2049_v20, %v779_v56  ;;  %v853_v54 = vsub.f32 %v2054_v53, %v779_v56 }
 0x172   :  { %v822_v10 = vsub.f32 %v2063_v49, %v734_v62  ;;  %v2266_v5 = vpop.eup %1427  ;;  %1453 = vpow2.f32 %v956_v13  ;;  %v823_v7 = vsub.f32 %v2059_v34, %v734_v62  ;;  %1051 = vadd.xlane.f32.xlu0 %v1050_v12  ;;  %v1005_v14 = vadd.f32 %v2261_v52, %v2257_v4 }
 0x173   :  { %v2271_v27 = vpop.eup %1429  ;;  %1455 = vpow2.f32 %v894_v19  ;;  %v958_v21 = vmul.f32 1.442695, %v852_v11  ;;  %v960_v23 = vmul.f32 1.442695, %v853_v54 }
 0x174   :  { %v898_v22 = vmul.f32 1.442695, %v822_v10  ;;  %v2273_v20 = vpop.eup %1431  ;;  %1457 = vpow2.f32 %v896_v61  ;;  %v900_v53 = vmul.f32 1.442695, %v823_v7  ;;  %1006 = vadd.xlane.f32.xlu1 %v1005_v14  ;;  %v737_v9 = vpop.xlane.xlu1 %736  ;;  %v1053_v34 = vadd.f32 %v2271_v27, %v2266_v5 }
 0x175   :  { %v782_v49 = vpop.xlane.xlu0 %781  ;;  %v2277_v48 = vpop.eup %1433  ;;  %1459 = vpow2.f32 %v958_v21  ;;  %v824_v29 = vsub.f32 %v2080_v6, %v737_v9  ;;  %v825_v46 = vsub.f32 %v2076_v50, %v737_v9 }
 0x176   :  { %v854_v24 = vsub.f32 %v2066_v59, %v782_v49  ;;  %v855_v30 = vsub.f32 %v2069_v0, %v782_v49  ;;  %v2282_v28 = vpop.eup %1435  ;;  %1461 = vpow2.f32 %v960_v23  ;;  %v1008_v63 = vadd.f32 %v2277_v48, %v2273_v20  ;;  %v2593_v49 = vld [vmem:[#allocation5_spill] sm:$0xff] }
 0x177   :  { %v2287_v37 = vpop.eup %1437  ;;  %1463 = vpow2.f32 %v898_v22  ;;  %v902_v47 = vmul.f32 1.442695, %v824_v29  ;;  %v904_v59 = vmul.f32 1.442695, %v825_v46 }
 0x178   :  { %v962_v35 = vmul.f32 1.442695, %v854_v24  ;;  %v964_v36 = vmul.f32 1.442695, %v855_v30  ;;  %v2289_v44 = vpop.eup %1439  ;;  %1465 = vpow2.f32 %v900_v53  ;;  %1009 = vadd.xlane.f32.xlu0 %v1008_v63  ;;  %1054 = vadd.xlane.f32.xlu1 %v1053_v34  ;;  %v785_v0 = vpop.xlane.xlu1 %784  ;;  %v1056_v50 = vadd.f32 %v2287_v37, %v2282_v28 }
 0x179   :  { %v740_v6 = vpop.xlane.xlu0 %739  ;;  %v2293_v45 = vpop.eup %1441  ;;  %v856_v43 = vsub.f32 %v2083_v16, %v785_v0  ;;  %v857_v13 = vsub.f32 %v2086_v18, %v785_v0  ;;  %v2595_v0 = vld [vmem:[#allocation7_spill] sm:$0xff] }
 0x17a   :  { %1467 = vpow2.f32 %v962_v35  ;;  %v826_v19 = vsub.f32 %v2097_v39, %v740_v6  ;;  %v2298_v61 = vpop.eup %1443  ;;  %v827_v56 = vsub.f32 %v2093_v33, %v740_v6  ;;  %v1011_v62 = vadd.f32 %v2293_v45, %v2289_v44 }
 0x17b   :  { %1469 = vpow2.f32 %v964_v36  ;;  %v2303_v12 = vpop.eup %1445  ;;  %v966_v11 = vmul.f32 1.442695, %v856_v43  ;;  %v968_v54 = vmul.f32 1.442695, %v857_v13 }
 0x17c   :  { %1471 = vpow2.f32 %v902_v47  ;;  %v906_v10 = vmul.f32 1.442695, %v826_v19  ;;  %v2305_v7 = vpop.eup %1447  ;;  %v908_v16 = vmul.f32 1.442695, %v827_v56  ;;  %1057 = vadd.xlane.f32.xlu0 %v1056_v50  ;;  %1012 = vadd.xlane.f32.xlu1 %v1011_v62  ;;  %v743_v39 = vpop.xlane.xlu1 %742  ;;  %v1059_v33 = vadd.f32 %v2303_v12, %v2298_v61  ;;  %v2594_v47 = vld [vmem:[#allocation6_spill] sm:$0xff]  ;;  %v2596_v50 = vld [vmem:[#allocation9_spill] sm:$0xff] }
 0x17d   :  { %1473 = vpow2.f32 %v904_v59  ;;  %v788_v18 = vpop.xlane.xlu0 %787  ;;  %v2309_v14 = vpop.eup %1449  ;;  %v828_v22 = vsub.f32 %v2114_v15, %v743_v39  ;;  %v829_v9 = vsub.f32 %v2593_v49, %v743_v39  ;;  %v2597_v19 = vld [vmem:[#allocation8_spill] sm:$0xff]  ;;  %v2598_v49 = vld [vmem:[#allocation10_spill] sm:$0xff] }
 0x17e   :  { %1475 = vpow2.f32 %v966_v11  ;;  %v858_v21 = vsub.f32 %v2100_v51, %v788_v18  ;;  %v859_v23 = vsub.f32 %v2105_v60, %v788_v18  ;;  %v2314_v53 = vpop.eup %1451  ;;  %v1014_v34 = vadd.f32 %v2309_v14, %v2305_v7 }
 0x17f   :  { %1477 = vpow2.f32 %v968_v54  ;;  %v2319_v24 = vpop.eup %1453  ;;  %v910_v46 = vmul.f32 1.442695, %v828_v22  ;;  %v912_v51 = vmul.f32 1.442695, %v829_v9 }
 0x180   :  { %1479 = vpow2.f32 %v906_v10  ;;  %v970_v30 = vmul.f32 1.442695, %v858_v21  ;;  %v972_v29 = vmul.f32 1.442695, %v859_v23  ;;  %v2321_v63 = vpop.eup %1455  ;;  %1015 = vadd.xlane.f32.xlu0 %v1014_v34  ;;  %1060 = vadd.xlane.f32.xlu1 %v1059_v33  ;;  %v791_v60 = vpop.xlane.xlu1 %790  ;;  %v1062_v35 = vadd.f32 %v2319_v24, %v2314_v53  ;;  %v2599_v34 = vld [vmem:[#allocation11_spill] sm:$0xff] }
 0x181   :  { %1481 = vpow2.f32 %v908_v16  ;;  %v746_v15 = vpop.xlane.xlu0 %745  ;;  %v2325_v36 = vpop.eup %1457  ;;  %v860_v59 = vsub.f32 %v2594_v47, %v791_v60  ;;  %v861_v6 = vsub.f32 %v2595_v0, %v791_v60 }
 0x182   :  { %1483 = vpow2.f32 %v970_v30  ;;  %v830_v43 = vsub.f32 %v2596_v50, %v746_v15  ;;  %v2330_v13 = vpop.eup %1459  ;;  %v831_v56 = vsub.f32 %v2597_v19, %v746_v15  ;;  %v1017_v62 = vadd.f32 %v2325_v36, %v2321_v63 }
 0x183   :  { %1485 = vpow2.f32 %v972_v29  ;;  %v2335_v11 = vpop.eup %1461  ;;  %v974_v54 = vmul.f32 1.442695, %v860_v59  ;;  %v976_v10 = vmul.f32 1.442695, %v861_v6  ;;  %v2600_v29 = vld [vmem:[#allocation13_spill] sm:$0xff] }
 0x184   :  { %1487 = vpow2.f32 %v910_v46  ;;  %v914_v16 = vmul.f32 1.442695, %v830_v43  ;;  %v2337_v18 = vpop.eup %1463  ;;  %v916_v39 = vmul.f32 1.442695, %v831_v56  ;;  %1063 = vadd.xlane.f32.xlu0 %v1062_v35  ;;  %1018 = vadd.xlane.f32.xlu1 %v1017_v62  ;;  %v749_v21 = vpop.xlane.xlu1 %748  ;;  %v1065_v23 = vadd.f32 %v2335_v11, %v2330_v13 }
 0x185   :  { %1489 = vpow2.f32 %v912_v51  ;;  %v794_v33 = vpop.xlane.xlu0 %793  ;;  %v2341_v22 = vpop.eup %1465  ;;  %v832_v46 = vsub.f32 %v2600_v29, %v749_v21  ;;  %v2601_v51 = vld [vmem:[#allocation12_spill] sm:$0xff] }
 0x186   :  { %1491 = vpow2.f32 %v974_v54  ;;  %v862_v9 = vsub.f32 %v2598_v49, %v794_v33  ;;  %v863_v30 = vsub.f32 %v2599_v34, %v794_v33  ;;  %v833_v15 = vsub.f32 %v2601_v51, %v749_v21  ;;  %v2604_v49 = vld [vmem:[#allocation17_spill] sm:$0xff] }
 0x187   :  { %v2346_v60 = vpop.eup %1467  ;;  %1493 = vpow2.f32 %v976_v10  ;;  %v1020_v35 = vadd.f32 %v2341_v22, %v2337_v18  ;;  %v918_v6 = vmul.f32 1.442695, %v832_v46  ;;  %v2602_v10 = vld [vmem:[#allocation14_spill] sm:$0xff] }
 0x188   :  { %v2351_v47 = vpop.eup %1469  ;;  %1495 = vpow2.f32 %v914_v16  ;;  %v978_v59 = vmul.f32 1.442695, %v862_v9  ;;  %v980_v0 = vmul.f32 1.442695, %v863_v30  ;;  %v920_v43 = vmul.f32 1.442695, %v833_v15  ;;  %1066 = vadd.xlane.f32.xlu1 %v1065_v23  ;;  %v797_v19 = vpop.xlane.xlu1 %796 }
 0x189   :  { %v2353_v50 = vpop.eup %1471  ;;  %1497 = vpow2.f32 %v916_v39  ;;  %1021 = vadd.xlane.f32.xlu0 %v1020_v35  ;;  %v752_v56 = vpop.xlane.xlu0 %751  ;;  %v1068_v62 = vadd.f32 %v2351_v47, %v2346_v60  ;;  %v864_v33 = vsub.f32 %v2602_v10, %v797_v19  ;;  %v2603_v16 = vld [vmem:[#allocation15_spill] sm:$0xff]  ;;  %v2605_v39 = vld [vmem:[#allocation16_spill] sm:$0xff] }
 0x18a   :  { %v2357_v54 = vpop.eup %1473  ;;  %1499 = vpow2.f32 %v978_v59  ;;  %v865_v21 = vsub.f32 %v2603_v16, %v797_v19  ;;  %v834_v9 = vsub.f32 %v2604_v49, %v752_v56  ;;  %v835_v30 = vsub.f32 %v2605_v39, %v752_v56 }
 0x18b   :  { %v2362_v34 = vpop.eup %1475  ;;  %1501 = vpow2.f32 %v980_v0  ;;  %v1023_v23 = vadd.f32 %v2357_v54, %v2353_v50  ;;  %v982_v46 = vmul.f32 1.442695, %v864_v33 }
 0x18c   :  { %v2367_v29 = vpop.eup %1477  ;;  %1503 = vpow2.f32 %v918_v6  ;;  %v984_v51 = vmul.f32 1.442695, %v865_v21  ;;  %v922_v15 = vmul.f32 1.442695, %v834_v9  ;;  %v924_v59 = vmul.f32 1.442695, %v835_v30  ;;  %v755_v10 = vpop.xlane.xlu1 %754 }
 0x18d   :  { %v2369_v35 = vpop.eup %1479  ;;  %1505 = vpow2.f32 %v920_v43  ;;  %1069 = vadd.xlane.f32.xlu0 %v1068_v62  ;;  %1024 = vadd.xlane.f32.xlu1 %v1023_v23  ;;  %v800_v19 = vpop.xlane.xlu0 %799  ;;  %v1071_v0 = vadd.f32 %v2367_v29, %v2362_v34  ;;  %v836_v33 = vsub.f32 %v2179_v57, %v755_v10  ;;  %v2606_v43 = vld [vmem:[#allocation18_spill] sm:$0xff] }
 0x18e   :  { %v2373_v56 = vpop.eup %1481  ;;  %1507 = vpow2.f32 %v982_v46  ;;  %v866_v16 = vsub.f32 %v2166_v31, %v800_v19  ;;  %v867_v6 = vsub.f32 %v2169_v42, %v800_v19  ;;  %v837_v62 = vsub.f32 %v2606_v43, %v755_v10 }
 0x18f   :  { %v2378_v21 = vpop.eup %1483  ;;  %1509 = vpow2.f32 %v984_v51  ;;  %v1026_v49 = vadd.f32 %v2373_v56, %v2369_v35  ;;  %v926_v23 = vmul.f32 1.442695, %v836_v33 }
 0x190   :  { %v2383_v9 = vpop.eup %1485  ;;  %1511 = vpow2.f32 %v922_v15  ;;  %v986_v39 = vmul.f32 1.442695, %v866_v16  ;;  %v988_v30 = vmul.f32 1.442695, %v867_v6  ;;  %v928_v42 = vmul.f32 1.442695, %v837_v62  ;;  %v803_v31 = vpop.xlane.xlu1 %802 }
 0x191   :  { %v2385_v46 = vpop.eup %1487  ;;  %1513 = vpow2.f32 %v924_v59  ;;  %1027 = vadd.xlane.f32.xlu0 %v1026_v49  ;;  %1072 = vadd.xlane.f32.xlu1 %v1071_v0  ;;  %v758_v57 = vpop.xlane.xlu0 %757  ;;  %v1074_v51 = vadd.f32 %v2383_v9, %v2378_v21  ;;  %v868_v10 = vsub.f32 %v2182_v2, %v803_v31  ;;  %v869_v15 = vsub.f32 %v2185_v26, %v803_v31 }
 0x192   :  { %v2389_v19 = vpop.eup %1489  ;;  %1515 = vpow2.f32 %v986_v39  ;;  %v838_v16 = vsub.f32 %v2195_v58, %v758_v57  ;;  %v839_v59 = vsub.f32 %v2192_v1, %v758_v57 }
 0x193   :  { %v2394_v6 = vpop.eup %1491  ;;  %1517 = vpow2.f32 %v988_v30  ;;  %v1029_v0 = vadd.f32 %v2389_v19, %v2385_v46  ;;  %v990_v43 = vmul.f32 1.442695, %v868_v10  ;;  %v992_v62 = vmul.f32 1.442695, %v869_v15 }
 0x194   :  { %v2399_v33 = vpop.eup %1493  ;;  %1519 = vpow2.f32 %v926_v23  ;;  %v930_v49 = vmul.f32 1.442695, %v838_v16  ;;  %v932_v2 = vmul.f32 1.442695, %v839_v59  ;;  %v761_v26 = vpop.xlane.xlu1 %760 }
 0x195   :  { %v2401_v39 = vpop.eup %1495  ;;  %1521 = vpow2.f32 %v928_v42  ;;  %1075 = vadd.xlane.f32.xlu0 %v1074_v51  ;;  %1030 = vadd.xlane.f32.xlu1 %v1029_v0  ;;  %v806_v58 = vpop.xlane.xlu0 %805  ;;  %v1077_v1 = vadd.f32 %v2399_v33, %v2394_v6  ;;  %v840_v57 = vsub.f32 %v2208_v8, %v761_v26  ;;  %v841_v42 = vsub.f32 %v2211_v17, %v761_v26 }
 0x196   :  { %v2405_v30 = vpop.eup %1497  ;;  %1523 = vpow2.f32 %v990_v43  ;;  %v870_v31 = vsub.f32 %v2198_v40, %v806_v58  ;;  %v871_v23 = vsub.f32 %v2203_v41, %v806_v58  ;;  %v2607_v58 = vld [vmem:[#allocation19_spill] sm:$0xff] }
 0x197   :  { %v2410_v10 = vpop.eup %1499  ;;  %1525 = vpow2.f32 %v992_v62  ;;  %v1032_v51 = vadd.f32 %v2405_v30, %v2401_v39  ;;  %v934_v0 = vmul.f32 1.442695, %v840_v57  ;;  %v936_v40 = vmul.f32 1.442695, %v841_v42 }
 0x198   :  { %v2415_v15 = vpop.eup %1501  ;;  %1527 = vpow2.f32 %v930_v49  ;;  %v994_v16 = vmul.f32 1.442695, %v870_v31  ;;  %v996_v59 = vmul.f32 1.442695, %v871_v23  ;;  %v809_v41 = vpop.xlane.xlu1 %808 }
 0x199   :  { %v2417_v43 = vpop.eup %1503  ;;  %1529 = vpow2.f32 %v932_v2  ;;  %1033 = vadd.xlane.f32.xlu0 %v1032_v51  ;;  %1078 = vadd.xlane.f32.xlu1 %v1077_v1  ;;  %v1080_v8 = vadd.f32 %v2415_v15, %v2410_v10  ;;  %v872_v62 = vsub.f32 %v2216_v55, %v809_v41  ;;  %v873_v49 = vsub.f32 %v2607_v58, %v809_v41 }
 0x19a   :  { %v2421_v17 = vpop.eup %1505  ;;  %1531 = vpow2.f32 %v994_v16 }
 0x19b   :  { %v2425_v26 = vpop.eup %1507  ;;  %1533 = vpow2.f32 %v996_v59  ;;  %v1035_v2 = vadd.f32 %v2421_v17, %v2417_v43  ;;  %v998_v1 = vmul.f32 1.442695, %v872_v62  ;;  %v1000_v23 = vmul.f32 1.442695, %v873_v49 }
 0x19c   :  { %v2429_v31 = vpop.eup %1509  ;;  %1535 = vpow2.f32 %v934_v0 }
 0x19d   :  { %v2431_v57 = vpop.eup %1511  ;;  %1537 = vpow2.f32 %v936_v40  ;;  %1081 = vadd.xlane.f32.xlu0 %v1080_v8  ;;  %1036 = vadd.xlane.f32.xlu1 %v1035_v2  ;;  %v1083_v55 = vadd.f32 %v2429_v31, %v2425_v26 }
 0x19e   :  { %v2435_v42 = vpop.eup %1513  ;;  %1539 = vpow2.f32 %v998_v1 }
 0x19f   :  { %v2437_v51 = vpop.eup %1515  ;;  %1541 = vpow2.f32 %v1000_v23  ;;  %v1038_v16 = vadd.f32 %v2435_v42, %v2431_v57 }
 0x1a0   :  { %v2441_v59 = vpop.eup %1517 }
 0x1a1   :  { %2608 = vst [vmem:[#allocation5_spill] sm:$0xff] %v2441_v59  ;;  %v2443_v0 = vpop.eup %1519  ;;  %1039 = vadd.xlane.f32.xlu0 %v1038_v16  ;;  %1084 = vadd.xlane.f32.xlu1 %v1083_v55  ;;  %v1086_v40 = vadd.f32 %v2441_v59, %v2437_v51 }
 0x1a2   :  { %2609 = vst [vmem:[#allocation6_spill] sm:$0xff] %v2443_v0  ;;  %v2447_v41 = vpop.eup %1521 }
 0x1a3   :  { %2610 = vst [vmem:[#allocation7_spill] sm:$0xff] %v2447_v41  ;;  %v2449_v8 = vpop.eup %1523  ;;  %v1041_v62 = vadd.f32 %v2447_v41, %v2443_v0 }
 0x1a4   :  { %2611 = vst [vmem:[#allocation9_spill] sm:$0xff] %v2449_v8  ;;  %v2453_v58 = vpop.eup %1525 }
 0x1a5   :  { %2612 = vst [vmem:[#allocation8_spill] sm:$0xff] %v2453_v58  ;;  %v2455_v49 = vpop.eup %1527  ;;  %1087 = vadd.xlane.f32.xlu0 %v1086_v40  ;;  %1042 = vadd.xlane.f32.xlu1 %v1041_v62  ;;  %v1089_v2 = vadd.f32 %v2453_v58, %v2449_v8 }
 0x1a6   :  { %2613 = vst [vmem:[#allocation10_spill] sm:$0xff] %v2455_v49  ;;  %v2459_v1 = vpop.eup %1529 }
 0x1a7   :  { %2614 = vst [vmem:[#allocation11_spill] sm:$0xff] %v2459_v1  ;;  %v2461_v23 = vpop.eup %1531  ;;  %v1044_v55 = vadd.f32 %v2459_v1, %v2455_v49 }
 0x1a8   :  { %2615 = vst [vmem:[#allocation13_spill] sm:$0xff] %v2461_v23  ;;  %v2465_v16 = vpop.eup %1533 }
 0x1a9   :  { %2616 = vst [vmem:[#allocation12_spill] sm:$0xff] %v2465_v16  ;;  %v2467_v59 = vpop.eup %1535  ;;  %1045 = vadd.xlane.f32.xlu0 %v1044_v55  ;;  %1090 = vadd.xlane.f32.xlu1 %v1089_v2  ;;  %v1092_v40 = vadd.f32 %v2465_v16, %v2461_v23 }
 0x1aa   :  { %2617 = vst [vmem:[#allocation14_spill] sm:$0xff] %v2467_v59  ;;  %v2471_v62 = vpop.eup %1537 }
 0x1ab   :  { %2618 = vst [vmem:[#allocation15_spill] sm:$0xff] %v2471_v62  ;;  %v2473_v41 = vpop.eup %1539  ;;  %v1047_v58 = vadd.f32 %v2471_v62, %v2467_v59 }
 0x1ac   :  { %v2477_v8 = vpop.eup %1541 }
 0x1ad   :  { %2619 = vst [vmem:[#allocation17_spill] sm:$0xff] %v2477_v8  ;;  %1093 = vadd.xlane.f32.xlu0 %v1092_v40  ;;  %1048 = vadd.xlane.f32.xlu1 %v1047_v58  ;;  %v1095_v1 = vadd.f32 %v2477_v8, %v2473_v41 }
 0x1b1   :  { %1096 = vadd.xlane.f32.xlu1 %v1095_v1 }
 0x1f7   :  { %v1004_v55 = vpop.xlane.xlu0 %1003 }
 0x1f8   :  { %1543 = vrcp.f32 %v1004_v55 }
 0x1fb   :  { %v1052_v2 = vpop.xlane.xlu0 %1051 }
 0x1fc   :  { %1545 = vrcp.f32 %v1052_v2 }
 0x1fd   :  { %v1007_v16 = vpop.xlane.xlu1 %1006 }
 0x1fe   :  { %1547 = vrcp.f32 %v1007_v16 }
 0x201   :  { %v1010_v23 = vpop.xlane.xlu0 %1009  ;;  %v1055_v49 = vpop.xlane.xlu1 %1054 }
 0x202   :  { %1549 = vrcp.f32 %v1010_v23 }
 0x203   :  { %1551 = vrcp.f32 %v1055_v49 }
 0x205   :  { %v1544_v0 = vpop.eup %1543  ;;  %v1058_v62 = vpop.xlane.xlu0 %1057 }
 0x206   :  { %v1013_v59 = vpop.xlane.xlu1 %1012  ;;  %v1162_v40 = vmul.f32 %v1544_v0, %v2242_v3  ;;  %v1163_v58 = vmul.f32 %v1544_v0, %v2245_v25  ;;  %1553 = vrcp.f32 %v1058_v62 }
 0x207   :  { %1555 = vrcp.f32 %v1013_v59 }
 0x208   :  { %1226 = vst [vmem:[#allocation2] sm:$0xff] %v1162_v40  ;;  %1227 = vst [vmem:[#allocation2 + $0x8] sm:$0xff] %v1163_v58 }
 0x209   :  { %v1546_v1 = vpop.eup %1545  ;;  %v1016_v55 = vpop.xlane.xlu0 %1015 }
 0x20a   :  { %v1061_v2 = vpop.xlane.xlu1 %1060  ;;  %v1194_v16 = vmul.f32 %v1546_v1, %v2252_v38  ;;  %v1195_v8 = vmul.f32 %v1546_v1, %v2255_v32  ;;  %1557 = vrcp.f32 %v1016_v55 }
 0x20b   :  { %v1548_v49 = vpop.eup %1547  ;;  %1559 = vrcp.f32 %v1061_v2 }
 0x20c   :  { %1258 = vst [vmem:[#allocation2 + $0x100] sm:$0xff] %v1194_v16  ;;  %1259 = vst [vmem:[#allocation2 + $0x108] sm:$0xff] %v1195_v8  ;;  %v1164_v3 = vmul.f32 %v1548_v49, %v2257_v4  ;;  %v1165_v25 = vmul.f32 %v1548_v49, %v2261_v52 }
 0x20d   :  { %v1064_v0 = vpop.xlane.xlu0 %1063 }
 0x20e   :  { %v1019_v59 = vpop.xlane.xlu1 %1018  ;;  %1228 = vst [vmem:[#allocation2 + $0x10] sm:$0xff] %v1164_v3  ;;  %1229 = vst [vmem:[#allocation2 + $0x18] sm:$0xff] %v1165_v25  ;;  %1561 = vrcp.f32 %v1064_v0 }
 0x20f   :  { %v1550_v23 = vpop.eup %1549  ;;  %1563 = vrcp.f32 %v1019_v59 }
 0x210   :  { %v1552_v62 = vpop.eup %1551  ;;  %v1166_v38 = vmul.f32 %v1550_v23, %v2273_v20  ;;  %v1167_v32 = vmul.f32 %v1550_v23, %v2277_v48 }
 0x211   :  { %v1196_v40 = vmul.f32 %v1552_v62, %v2266_v5  ;;  %v1197_v8 = vmul.f32 %v1552_v62, %v2271_v27 }
 0x212   :  { %v1022_v58 = vpop.xlane.xlu0 %1021  ;;  %v1067_v4 = vpop.xlane.xlu1 %1066  ;;  %1230 = vst [vmem:[#allocation2 + $0x20] sm:$0xff] %v1166_v38  ;;  %1231 = vst [vmem:[#allocation2 + $0x28] sm:$0xff] %v1167_v32 }
 0x213   :  { %1565 = vrcp.f32 %v1022_v58  ;;  %v1554_v52 = vpop.eup %1553  ;;  %1260 = vst [vmem:[#allocation2 + $0x110] sm:$0xff] %v1196_v40  ;;  %1261 = vst [vmem:[#allocation2 + $0x118] sm:$0xff] %v1197_v8 }
 0x214   :  { %1567 = vrcp.f32 %v1067_v4  ;;  %v1556_v1 = vpop.eup %1555  ;;  %v1198_v55 = vmul.f32 %v1554_v52, %v2282_v28  ;;  %v1199_v20 = vmul.f32 %v1554_v52, %v2287_v37 }
 0x215   :  { %v1168_v48 = vmul.f32 %v1556_v1, %v2289_v44  ;;  %v1169_v5 = vmul.f32 %v1556_v1, %v2293_v45 }
 0x216   :  { %v1070_v2 = vpop.xlane.xlu0 %1069  ;;  %v1025_v27 = vpop.xlane.xlu1 %1024  ;;  %1262 = vst [vmem:[#allocation2 + $0x120] sm:$0xff] %v1198_v55  ;;  %1263 = vst [vmem:[#allocation2 + $0x128] sm:$0xff] %v1199_v20 }
 0x217   :  { %1569 = vrcp.f32 %v1070_v2  ;;  %v1558_v16 = vpop.eup %1557  ;;  %1232 = vst [vmem:[#allocation2 + $0x30] sm:$0xff] %v1168_v48  ;;  %1233 = vst [vmem:[#allocation2 + $0x38] sm:$0xff] %v1169_v5 }
 0x218   :  { %1571 = vrcp.f32 %v1025_v27  ;;  %v1560_v49 = vpop.eup %1559  ;;  %v1170_v3 = vmul.f32 %v1558_v16, %v2305_v7  ;;  %v1171_v28 = vmul.f32 %v1558_v16, %v2309_v14 }
 0x219   :  { %v1200_v37 = vmul.f32 %v1560_v49, %v2298_v61  ;;  %v1201_v44 = vmul.f32 %v1560_v49, %v2303_v12 }
 0x21a   :  { %v1028_v25 = vpop.xlane.xlu0 %1027  ;;  %v1073_v45 = vpop.xlane.xlu1 %1072  ;;  %1234 = vst [vmem:[#allocation2 + $0x40] sm:$0xff] %v1170_v3  ;;  %1235 = vst [vmem:[#allocation2 + $0x48] sm:$0xff] %v1171_v28 }
 0x21b   :  { %1573 = vrcp.f32 %v1028_v25  ;;  %v1562_v0 = vpop.eup %1561  ;;  %1264 = vst [vmem:[#allocation2 + $0x130] sm:$0xff] %v1200_v37  ;;  %1265 = vst [vmem:[#allocation2 + $0x138] sm:$0xff] %v1201_v44 }
 0x21c   :  { %1575 = vrcp.f32 %v1073_v45  ;;  %v1564_v59 = vpop.eup %1563  ;;  %v1202_v23 = vmul.f32 %v1562_v0, %v2314_v53  ;;  %v1203_v7 = vmul.f32 %v1562_v0, %v2319_v24 }
 0x21d   :  { %v1172_v14 = vmul.f32 %v1564_v59, %v2321_v63  ;;  %v1173_v61 = vmul.f32 %v1564_v59, %v2325_v36 }
 0x21e   :  { %v1076_v62 = vpop.xlane.xlu0 %1075  ;;  %v1031_v12 = vpop.xlane.xlu1 %1030  ;;  %1266 = vst [vmem:[#allocation2 + $0x140] sm:$0xff] %v1202_v23  ;;  %1267 = vst [vmem:[#allocation2 + $0x148] sm:$0xff] %v1203_v7 }
 0x21f   :  { %1577 = vrcp.f32 %v1076_v62  ;;  %1236 = vst [vmem:[#allocation2 + $0x50] sm:$0xff] %v1172_v14  ;;  %1237 = vst [vmem:[#allocation2 + $0x58] sm:$0xff] %v1173_v61 }
 0x220   :  { %v1566_v38 = vpop.eup %1565  ;;  %1579 = vrcp.f32 %v1031_v12 }
 0x221   :  { %v1568_v32 = vpop.eup %1567  ;;  %v1174_v40 = vmul.f32 %v1566_v38, %v2337_v18  ;;  %v1175_v53 = vmul.f32 %v1566_v38, %v2341_v22  ;;  %v2620_v38 = vld [vmem:[#allocation5_spill] sm:$0xff] }
 0x222   :  { %v1204_v24 = vmul.f32 %v1568_v32, %v2330_v13  ;;  %v1205_v63 = vmul.f32 %v1568_v32, %v2335_v11  ;;  %v1034_v8 = vpop.xlane.xlu0 %1033  ;;  %v1079_v36 = vpop.xlane.xlu1 %1078 }
 0x223   :  { %1238 = vst [vmem:[#allocation2 + $0x60] sm:$0xff] %v1174_v40  ;;  %1239 = vst [vmem:[#allocation2 + $0x68] sm:$0xff] %v1175_v53  ;;  %1581 = vrcp.f32 %v1034_v8  ;;  %v2621_v40 = vld [vmem:[#allocation6_spill] sm:$0xff]  ;;  %v2622_v53 = vld [vmem:[#allocation7_spill] sm:$0xff] }
 0x224   :  { %v1570_v58 = vpop.eup %1569  ;;  %1268 = vst [vmem:[#allocation2 + $0x150] sm:$0xff] %v1204_v24  ;;  %1269 = vst [vmem:[#allocation2 + $0x158] sm:$0xff] %v1205_v63  ;;  %1583 = vrcp.f32 %v1079_v36  ;;  %v2623_v24 = vld [vmem:[#allocation10_spill] sm:$0xff]  ;;  %v2624_v8 = vld [vmem:[#allocation11_spill] sm:$0xff] }
 0x225   :  { %v1572_v4 = vpop.eup %1571  ;;  %v1206_v52 = vmul.f32 %v1570_v58, %v2346_v60  ;;  %v1207_v18 = vmul.f32 %v1570_v58, %v2351_v47  ;;  %v2625_v58 = vld [vmem:[#allocation9_spill] sm:$0xff] }
 0x226   :  { %v1176_v22 = vmul.f32 %v1572_v4, %v2353_v50  ;;  %v1177_v13 = vmul.f32 %v1572_v4, %v2357_v54  ;;  %v1082_v1 = vpop.xlane.xlu0 %1081  ;;  %v1037_v11 = vpop.xlane.xlu1 %1036 }
 0x227   :  { %1270 = vst [vmem:[#allocation2 + $0x160] sm:$0xff] %v1206_v52  ;;  %1271 = vst [vmem:[#allocation2 + $0x168] sm:$0xff] %v1207_v18  ;;  %1585 = vrcp.f32 %v1082_v1  ;;  %v2626_v52 = vld [vmem:[#allocation8_spill] sm:$0xff] }
 0x228   :  { %v1574_v55 = vpop.eup %1573  ;;  %1240 = vst [vmem:[#allocation2 + $0x70] sm:$0xff] %v1176_v22  ;;  %1241 = vst [vmem:[#allocation2 + $0x78] sm:$0xff] %v1177_v13  ;;  %1587 = vrcp.f32 %v1037_v11  ;;  %v2627_v13 = vld [vmem:[#allocation13_spill] sm:$0xff]  ;;  %v2628_v11 = vld [vmem:[#allocation12_spill] sm:$0xff] }
 0x229   :  { %v1576_v20 = vpop.eup %1575  ;;  %v1178_v48 = vmul.f32 %v1574_v55, %v2369_v35  ;;  %v1179_v60 = vmul.f32 %v1574_v55, %v2373_v56 }
 0x22a   :  { %v1208_v47 = vmul.f32 %v1576_v20, %v2362_v34  ;;  %v1209_v50 = vmul.f32 %v1576_v20, %v2367_v29  ;;  %v1040_v5 = vpop.xlane.xlu0 %1039  ;;  %v1085_v54 = vpop.xlane.xlu1 %1084  ;;  %v2629_v20 = vld [vmem:[#allocation14_spill] sm:$0xff] }
 0x22b   :  { %1242 = vst [vmem:[#allocation2 + $0x80] sm:$0xff] %v1178_v48  ;;  %1243 = vst [vmem:[#allocation2 + $0x88] sm:$0xff] %v1179_v60  ;;  %1589 = vrcp.f32 %v1040_v5  ;;  %v2630_v60 = vld [vmem:[#allocation15_spill] sm:$0xff] }
 0x22c   :  { %v1578_v2 = vpop.eup %1577  ;;  %1272 = vst [vmem:[#allocation2 + $0x170] sm:$0xff] %v1208_v47  ;;  %1273 = vst [vmem:[#allocation2 + $0x178] sm:$0xff] %v1209_v50  ;;  %1591 = vrcp.f32 %v1085_v54  ;;  %v2631_v54 = vld [vmem:[#allocation17_spill] sm:$0xff] }
 0x22d   :  { %v1580_v27 = vpop.eup %1579  ;;  %v1210_v16 = vmul.f32 %v1578_v2, %v2378_v21  ;;  %v1211_v35 = vmul.f32 %v1578_v2, %v2383_v9 }
 0x22e   :  { %v1180_v56 = vmul.f32 %v1580_v27, %v2385_v46  ;;  %v1181_v34 = vmul.f32 %v1580_v27, %v2389_v19  ;;  %v1088_v49 = vpop.xlane.xlu0 %1087  ;;  %v1043_v29 = vpop.xlane.xlu1 %1042 }
 0x22f   :  { %1274 = vst [vmem:[#allocation2 + $0x180] sm:$0xff] %v1210_v16  ;;  %1275 = vst [vmem:[#allocation2 + $0x188] sm:$0xff] %v1211_v35  ;;  %1593 = vrcp.f32 %v1088_v49 }
 0x230   :  { %v1582_v3 = vpop.eup %1581  ;;  %1244 = vst [vmem:[#allocation2 + $0x90] sm:$0xff] %v1180_v56  ;;  %1245 = vst [vmem:[#allocation2 + $0x98] sm:$0xff] %v1181_v34  ;;  %1595 = vrcp.f32 %v1043_v29 }
 0x231   :  { %v1584_v28 = vpop.eup %1583  ;;  %v1182_v37 = vmul.f32 %v1582_v3, %v2401_v39  ;;  %v1183_v21 = vmul.f32 %v1582_v3, %v2405_v30 }
 0x232   :  { %v1212_v9 = vmul.f32 %v1584_v28, %v2394_v6  ;;  %v1213_v46 = vmul.f32 %v1584_v28, %v2399_v33  ;;  %v1046_v44 = vpop.xlane.xlu0 %1045  ;;  %v1091_v19 = vpop.xlane.xlu1 %1090 }
 0x233   :  { %1246 = vst [vmem:[#allocation2 + $0xa0] sm:$0xff] %v1182_v37  ;;  %1247 = vst [vmem:[#allocation2 + $0xa8] sm:$0xff] %v1183_v21  ;;  %1597 = vrcp.f32 %v1046_v44 }
 0x234   :  { %v1586_v25 = vpop.eup %1585  ;;  %1276 = vst [vmem:[#allocation2 + $0x190] sm:$0xff] %v1212_v9  ;;  %1277 = vst [vmem:[#allocation2 + $0x198] sm:$0xff] %v1213_v46  ;;  %1599 = vrcp.f32 %v1091_v19 }
 0x235   :  { %v1588_v45 = vpop.eup %1587  ;;  %v1214_v0 = vmul.f32 %v1586_v25, %v2410_v10  ;;  %v1215_v39 = vmul.f32 %v1586_v25, %v2415_v15 }
 0x236   :  { %v1184_v30 = vmul.f32 %v1588_v45, %v2417_v43  ;;  %v1185_v6 = vmul.f32 %v1588_v45, %v2421_v17  ;;  %v1094_v59 = vpop.xlane.xlu0 %1093  ;;  %v1049_v33 = vpop.xlane.xlu1 %1048 }
 0x237   :  { %1278 = vst [vmem:[#allocation2 + $0x1a0] sm:$0xff] %v1214_v0  ;;  %1279 = vst [vmem:[#allocation2 + $0x1a8] sm:$0xff] %v1215_v39  ;;  %1601 = vrcp.f32 %v1094_v59 }
 0x238   :  { %v1590_v23 = vpop.eup %1589  ;;  %1248 = vst [vmem:[#allocation2 + $0xb0] sm:$0xff] %v1184_v30  ;;  %1249 = vst [vmem:[#allocation2 + $0xb8] sm:$0xff] %v1185_v6  ;;  %1603 = vrcp.f32 %v1049_v33 }
 0x239   :  { %v1592_v7 = vpop.eup %1591  ;;  %v1186_v14 = vmul.f32 %v1590_v23, %v2431_v57  ;;  %v1187_v10 = vmul.f32 %v1590_v23, %v2435_v42 }
 0x23a   :  { %v1216_v15 = vmul.f32 %v1592_v7, %v2425_v26  ;;  %v1217_v43 = vmul.f32 %v1592_v7, %v2429_v31  ;;  %v1097_v61 = vpop.xlane.xlu1 %1096 }
 0x23b   :  { %1250 = vst [vmem:[#allocation2 + $0xc0] sm:$0xff] %v1186_v14  ;;  %1251 = vst [vmem:[#allocation2 + $0xc8] sm:$0xff] %v1187_v10  ;;  %1605 = vrcp.f32 %v1097_v61 }
 0x23c   :  { %v1594_v17 = vpop.eup %1593  ;;  %1280 = vst [vmem:[#allocation2 + $0x1b0] sm:$0xff] %v1216_v15  ;;  %1281 = vst [vmem:[#allocation2 + $0x1b8] sm:$0xff] %v1217_v43 }
 0x23d   :  { %v1596_v62 = vpop.eup %1595  ;;  %v1218_v12 = vmul.f32 %v1594_v17, %v2437_v51  ;;  %v1219_v32 = vmul.f32 %v1594_v17, %v2620_v38 }
 0x23e   :  { %v1188_v57 = vmul.f32 %v1596_v62, %v2621_v40  ;;  %v1189_v42 = vmul.f32 %v1596_v62, %v2622_v53 }
 0x23f   :  { %1282 = vst [vmem:[#allocation2 + $0x1c0] sm:$0xff] %v1218_v12  ;;  %1283 = vst [vmem:[#allocation2 + $0x1c8] sm:$0xff] %v1219_v32 }
 0x240   :  { %v1598_v26 = vpop.eup %1597  ;;  %1252 = vst [vmem:[#allocation2 + $0xd0] sm:$0xff] %v1188_v57  ;;  %1253 = vst [vmem:[#allocation2 + $0xd8] sm:$0xff] %v1189_v42 }
 0x241   :  { %v1600_v31 = vpop.eup %1599  ;;  %v1190_v63 = vmul.f32 %v1598_v26, %v2623_v24  ;;  %v1191_v36 = vmul.f32 %v1598_v26, %v2624_v8 }
 0x242   :  { %v1220_v4 = vmul.f32 %v1600_v31, %v2625_v58  ;;  %v1221_v51 = vmul.f32 %v1600_v31, %v2626_v52 }
 0x243   :  { %1254 = vst [vmem:[#allocation2 + $0xe0] sm:$0xff] %v1190_v63  ;;  %1255 = vst [vmem:[#allocation2 + $0xe8] sm:$0xff] %v1191_v36 }
 0x244   :  { %v1602_v18 = vpop.eup %1601  ;;  %1284 = vst [vmem:[#allocation2 + $0x1d0] sm:$0xff] %v1220_v4  ;;  %1285 = vst [vmem:[#allocation2 + $0x1d8] sm:$0xff] %v1221_v51 }
 0x245   :  { %v1604_v22 = vpop.eup %1603  ;;  %v1222_v1 = vmul.f32 %v1602_v18, %v2627_v13  ;;  %v1223_v55 = vmul.f32 %v1602_v18, %v2628_v11 }
 0x246   :  { %v1192_v48 = vmul.f32 %v1604_v22, %v2629_v20  ;;  %v1193_v47 = vmul.f32 %v1604_v22, %v2630_v60 }
 0x247   :  { %1286 = vst [vmem:[#allocation2 + $0x1e0] sm:$0xff] %v1222_v1  ;;  %1287 = vst [vmem:[#allocation2 + $0x1e8] sm:$0xff] %v1223_v55 }
 0x248   :  { %v1606_v50 = vpop.eup %1605  ;;  %1256 = vst [vmem:[#allocation2 + $0xf0] sm:$0xff] %v1192_v48  ;;  %1257 = vst [vmem:[#allocation2 + $0xf8] sm:$0xff] %v1193_v47 }
 0x249   :  { %v1224_v5 = vmul.f32 %v1606_v50, %v2473_v41  ;;  %v1225_v2 = vmul.f32 %v1606_v50, %v2631_v54 }
 0x24b   :  { %1288 = vst [vmem:[#allocation2 + $0x1f0] sm:$0xff] %v1224_v5  ;;  %1289 = vst [vmem:[#allocation2 + $0x1f8] sm:$0xff] %v1225_v2 }
 0x24c   :  { %1618 = shalt.err (!%p1615_p4)
}
 0x24d   :  { %s1631_s18 = smov 256   ;;  %s1632_s19 = smov 16  }
 0x24e   :  { %1301 = dma.vmem_to_hbm [thread:$0]  %s1296_s16, 8192, %s2550_s2, [#allocation3], %s1631_s18, %s1631_s18, %s1632_s19  }
 0x24f   :  { %1627 = dma.done.wait [#allocation3], 8192  }
 0x250   :  { %1628 = vsyncadd [#allocation3], 4294959104 }
 0x251   :  { %1305 = vsyncpa [#allocation3], 1 }

</bundles_post_ra>
